<compile_context>
chip_gen: v7x
topology: tpu7x:2x2x1
jax: 0.10.0
libtpu: 0.0.40
codegen_flags: <defaults>
</compile_context>

<pallas_src>
import functools
import math

import jax
import jax.numpy as jnp
from jax.experimental import pallas as pl
from jax.experimental.pallas import tpu as pltpu


# ------------------------------ fused Pallas kernel ------------------------------

def _fused_forward_kernel(
    emb_ref, bias_ref, eg_ref, eb_ref,
    wqkv_ref, bqkv_ref, wo_ref, bo_ref,
    ln1g_ref, ln1b_ref, w1_ref, b1_ref, w2_ref, b2_ref, ln2g_ref, ln2b_ref,
    wcls_ref, bcls_ref, out_ref,
    *, S, H, nH, Dh, L, eps):
    """One grid step == one batch row: embedding LN -> L encoder layers -> vocab head."""

    def layer_norm(x, g, b):
        mean = jnp.mean(x, axis=-1, keepdims=True)
        var = jnp.mean(jnp.square(x - mean), axis=-1, keepdims=True)
        return (x - mean) * jax.lax.rsqrt(var + eps) * g + b

    def gelu(x):
        c = 0.7978845608028654  # sqrt(2/pi), BERT tanh-approx GELU
        return 0.5 * x * (1.0 + jnp.tanh(c * (x + 0.044715 * x * x * x)))

    scale = 1.0 / math.sqrt(Dh)
    bias = bias_ref[0]                                        # (S, S) additive mask, f32
    x = layer_norm(emb_ref[0], eg_ref[...], eb_ref[...])      # (S, H) f32, vreg/VMEM resident

    for l in range(L):  # static unroll (L=2); stream over a grid axis when L grows
        # ---- self attention: one fused QKV matmul, all heads in ONE batched dot_general ----
        qkv = jnp.dot(x.astype(jnp.bfloat16), wqkv_ref[l],
                      preferred_element_type=jnp.float32) + bqkv_ref[l]      # (S, 3H) f32

        def heads(base, _qkv=qkv):
            # (nH, S, Dh) bf16, head axis leading (lane slices + major-axis stack only)
            return jnp.stack([_qkv[:, base + h * Dh: base + (h + 1) * Dh]
                              for h in range(nH)], axis=0).astype(jnp.bfloat16)

        q, k, v = heads(0), heads(H), heads(2 * H)
        s = jnp.einsum("hqd,hkd->hqk", q, k,
                       preferred_element_type=jnp.float32) * scale + bias[None]  # (nH,S,S)
        s = s - jnp.max(s, axis=-1, keepdims=True)
        p = jnp.exp(s)
        p = p * pl.reciprocal(jnp.sum(p, axis=-1, keepdims=True), approx=True)    # EUP slot
        ctx = jnp.einsum("hqk,hkd->hqd", p.astype(jnp.bfloat16), v,
                         preferred_element_type=jnp.float32)                      # (nH,S,Dh)
        # output projection as a single head-batched matmul; summing per-head partials is
        # mathematically identical to concat_h(ctx_h) @ Wo (no transpose-back needed)
        parts = jnp.einsum("hqd,hdo->hqo", ctx.astype(jnp.bfloat16), wo_ref[l],
                           preferred_element_type=jnp.float32)                    # (nH,S,H)
        attn = parts[0]
        for h in range(1, nH):
            attn = attn + parts[h]
        attn = attn + bo_ref[l]
        x = layer_norm(attn + x, ln1g_ref[l], ln1b_ref[l])    # fused residual + LN

        # ---- FFN with fused GELU and fused residual + layernorm ----
        inter = gelu(jnp.dot(x.astype(jnp.bfloat16), w1_ref[l],
                             preferred_element_type=jnp.float32) + b1_ref[l])
        ffn = jnp.dot(inter.astype(jnp.bfloat16), w2_ref[l],
                      preferred_element_type=jnp.float32) + b2_ref[l]
        x = layer_norm(ffn + x, ln2g_ref[l], ln2b_ref[l])

    # ---- vocab head (lane-padded to 128 -> single unmasked lane-dense store) ----
    logits = jnp.dot(x.astype(jnp.bfloat16), wcls_ref[...],
                     preferred_element_type=jnp.float32) + bcls_ref[...]
    out_ref[0] = logits.astype(out_ref.dtype)


def _batched_spec(shape):
    """Per-batch block: (1, *rest) tile indexed by the batch grid coordinate."""
    nd = len(shape)
    return pl.BlockSpec((1,) + tuple(shape[1:]),
                        lambda b, _nd=nd: (b,) + (0,) * (_nd - 1))


def _const_spec(shape):
    """Full-array block, same block for every grid step (fetched once, no re-DMA)."""
    nd = len(shape)
    return pl.BlockSpec(tuple(shape), lambda b, _nd=nd: (0,) * _nd)


def fused_forward(packed, emb, bias, *, B, S, H, nH, L, Vp):
    Dh = H // nH
    inputs = [
        emb, bias,
        packed["emb_ln_g"], packed["emb_ln_b"],
        packed["wqkv"], packed["bqkv"], packed["wo"], packed["bo"],
        packed["ln1_g"], packed["ln1_b"],
        packed["w1"], packed["b1"], packed["w2"], packed["b2"],
        packed["ln2_g"], packed["ln2_b"],
        packed["w_cls"], packed["b_cls"],
    ]
    in_specs = ([_batched_spec(emb.shape), _batched_spec(bias.shape)]
                + [_const_spec(a.shape) for a in inputs[2:]])
    return pl.pallas_call(
        functools.partial(_fused_forward_kernel,
                          S=S, H=H, nH=nH, Dh=Dh, L=L, eps=1e-12),
        grid=(B,),
        in_specs=in_specs,
        out_specs=_batched_spec((B, S, Vp)),
        out_shape=jax.ShapeDtypeStruct((B, S, Vp), jnp.float32),
        compiler_params=pltpu.CompilerParams(
            dimension_semantics=("parallel",),          # shards batch across v7x's 2 TCs
            vmem_limit_bytes=32 * 1024 * 1024),
    )(*inputs)


# ------------------------------ model glue (plain JAX) ------------------------------

def build_additive_mask(input_ids, attention_mask, sep_token_id):
    """padding mask * (causal tril OR bidirectional prefix up to [SEP]) -> additive bias."""
    B, S = input_ids.shape
    has_sep = (input_ids == sep_token_id)
    any_sep = jnp.any(has_sep, axis=1)
    sep_pos = jnp.where(any_sep, jnp.argmax(has_sep, axis=1), S - 1)   # fallback seq_len-1
    r = jnp.arange(S)
    causal = r[None, :, None] >= r[None, None, :]                      # tril
    prefix = (r[None, :, None] <= sep_pos[:, None, None]) & \
             (r[None, None, :] <= sep_pos[:, None, None])
    mask = jnp.where(causal | prefix, 1.0, 0.0)
    mask = mask * attention_mask[:, None, :].astype(jnp.float32)       # broadcast over keys
    return (1.0 - mask) * -1e9                                         # additive bias


def pack_params(params):
    """One-time packing at init: stack per-layer weights along L, fuse QKV, reshape Wo to
    (nH, Dh, H), lane-pad the vocab head to 128, cast matmul weights to bf16."""
    H = params["hidden"]
    nH = params["heads"]
    Dh = H // nH
    V = params["vocab"]
    Vp = ((V + 127) // 128) * 128
    layers = params["layers"]
    wdt = jnp.bfloat16

    def stack(fn):
        return jnp.stack([fn(lp) for lp in layers])

    packed = {
        # embedding tables stay f32 (gather + add happen in the thin JAX wrapper)
        "word_emb": params["word_emb"],
        "pos_emb": params["pos_emb"],
        "type_emb": params["type_emb"],
        "emb_ln_g": params["emb_ln_g"].reshape(1, H),
        "emb_ln_b": params["emb_ln_b"].reshape(1, H),
        "wqkv": stack(lambda lp: jnp.concatenate([lp["wq"], lp["wk"], lp["wv"]], axis=1)).astype(wdt),
        "bqkv": stack(lambda lp: jnp.concatenate([lp["bq"], lp["bk"], lp["bv"]]).reshape(1, 3 * H)),
        "wo": stack(lambda lp: lp["wo"].reshape(nH, Dh, H)).astype(wdt),
        "bo": stack(lambda lp: lp["bo"].reshape(1, H)),
        "ln1_g": stack(lambda lp: lp["ln1_g"].reshape(1, H)),
        "ln1_b": stack(lambda lp: lp["ln1_b"].reshape(1, H)),
        "w1": stack(lambda lp: lp["w1"]).astype(wdt),
        "b1": stack(lambda lp: lp["b1"].reshape(1, -1)),
        "w2": stack(lambda lp: lp["w2"]).astype(wdt),
        "b2": stack(lambda lp: lp["b2"].reshape(1, H)),
        "ln2_g": stack(lambda lp: lp["ln2_g"].reshape(1, H)),
        "ln2_b": stack(lambda lp: lp["ln2_b"].reshape(1, H)),
        # zero-pad vocab columns to a multiple of 128; wrapper slices padded logits back off
        "w_cls": jnp.pad(params["w_cls"], ((0, 0), (0, Vp - V))).astype(wdt),
        "b_cls": jnp.pad(params["b_cls"], (0, Vp - V)).reshape(1, Vp),
    }
    return packed


@functools.partial(jax.jit, static_argnames=("vocab", "sep_token_id"))
def language_model_forward(packed, input_ids, attention_mask=None, *, vocab, sep_token_id=3):
    B, S = input_ids.shape
    H = packed["word_emb"].shape[1]
    L, nH = packed["wo"].shape[0], packed["wo"].shape[1]
    Vp = packed["w_cls"].shape[1]
    if attention_mask is None:
        attention_mask = jnp.ones_like(input_ids)
    bias = build_additive_mask(input_ids, attention_mask, sep_token_id)
    # embeddings (word gather + position + type) -- gather stays as glue outside the kernel
    emb = (packed["word_emb"][input_ids]
           + packed["pos_emb"][:S][None, :, :]
           + packed["type_emb"][0][None, None, :]).astype(jnp.float32)
    logits_p = fused_forward(packed, emb, bias, B=B, S=S, H=H, nH=nH, L=L, Vp=Vp)
    return logits_p[:, :, :vocab]


def init_params(key, hidden, vocab, layers, heads, intermediate,
                max_pos=64, type_vocab=2):
    keys = iter(jax.random.split(key, 16 + 16 * layers))

    def nk(shape):
        return 0.02 * jax.random.normal(next(keys), shape, dtype=jnp.float32)

    def zeros(n):
        return jnp.zeros((n,), jnp.float32)

    def ones(n):
        return jnp.ones((n,), jnp.float32)

    params = {
        "hidden": hidden, "heads": heads, "vocab": vocab,
        "word_emb": nk((vocab, hidden)),
        "pos_emb": nk((max_pos, hidden)),
        "type_emb": nk((type_vocab, hidden)),
        "emb_ln_g": ones(hidden), "emb_ln_b": zeros(hidden),
        "w_cls": nk((hidden, vocab)), "b_cls": zeros(vocab),
        "layers": [],
    }
    for _ in range(layers):
        params["layers"].append({
            "wq": nk((hidden, hidden)), "bq": zeros(hidden),
            "wk": nk((hidden, hidden)), "bk": zeros(hidden),
            "wv": nk((hidden, hidden)), "bv": zeros(hidden),
            "wo": nk((hidden, hidden)), "bo": zeros(hidden),
            "ln1_g": ones(hidden), "ln1_b": zeros(hidden),
            "w1": nk((hidden, intermediate)), "b1": zeros(intermediate),
            "w2": nk((intermediate, hidden)), "b2": zeros(hidden),
            "ln2_g": ones(hidden), "ln2_b": zeros(hidden),
        })
    return params


if __name__ == "__main__":
    B, S = 2, 8
    HIDDEN, VOCAB, LAYERS, HEADS, INTER = 32, 30, 2, 2, 64
    SEP_TOKEN_ID = 3

    key = jax.random.PRNGKey(0)
    pkey, ikey = jax.random.split(key)
    params = init_params(pkey, HIDDEN, VOCAB, LAYERS, HEADS, INTER)

    # weight packing happens ONCE at init, not in the per-call path
    packed = jax.block_until_ready(pack_params(params))

    input_ids = jax.random.randint(ikey, (B, S), 4, VOCAB, dtype=jnp.int32)
    # exactly one [SEP] per row (the reference assumes this layout)
    input_ids = input_ids.at[0, 3].set(SEP_TOKEN_ID).at[1, 5].set(SEP_TOKEN_ID)

    logits = language_model_forward(packed, input_ids, None,
                                    vocab=VOCAB, sep_token_id=SEP_TOKEN_ID)
    logits = jax.block_until_ready(logits)

    assert logits.shape == (B, S, VOCAB), logits.shape
    assert bool(jnp.all(jnp.isfinite(logits)))
    print("KERNEL_OK")
</pallas_src>

<mosaic_0001>
module attributes {stable_mosaic.version = 11 : i64} {
  func.func @_fused_forward_kernel(%arg0: i32, %arg1: memref<1x8x32xf32, #tpu.memory_space<vmem>>, %arg2: memref<1x8x8xf32, #tpu.memory_space<vmem>>, %arg3: memref<1x32xf32, #tpu.memory_space<vmem>>, %arg4: memref<1x32xf32, #tpu.memory_space<vmem>>, %arg5: memref<2x32x96xbf16, #tpu.memory_space<vmem>>, %arg6: memref<2x1x96xf32, #tpu.memory_space<vmem>>, %arg7: memref<2x2x16x32xbf16, #tpu.memory_space<vmem>>, %arg8: memref<2x1x32xf32, #tpu.memory_space<vmem>>, %arg9: memref<2x1x32xf32, #tpu.memory_space<vmem>>, %arg10: memref<2x1x32xf32, #tpu.memory_space<vmem>>, %arg11: memref<2x32x64xbf16, #tpu.memory_space<vmem>>, %arg12: memref<2x1x64xf32, #tpu.memory_space<vmem>>, %arg13: memref<2x64x32xbf16, #tpu.memory_space<vmem>>, %arg14: memref<2x1x32xf32, #tpu.memory_space<vmem>>, %arg15: memref<2x1x32xf32, #tpu.memory_space<vmem>>, %arg16: memref<2x1x32xf32, #tpu.memory_space<vmem>>, %arg17: memref<32x128xbf16, #tpu.memory_space<vmem>>, %arg18: memref<1x128xf32, #tpu.memory_space<vmem>>, %arg19: memref<1x8x128xf32, #tpu.memory_space<vmem>>) attributes {dimension_semantics = [#tpu.dimension_semantics<parallel>], iteration_bounds = array<i64: 2>, scalar_prefetch = 0 : i64, scratch_operands = 0 : i64, tpu.core_type = #tpu.core_type<tc>, window_params = [{transform_indices = @transform_0, window_bounds = array<i64: 1, 8, 32>}, {transform_indices = @transform_1, window_bounds = array<i64: 1, 8, 8>}, {pipeline_mode = #tpu.pipeline_mode<synchronous>, transform_indices = @transform_2, window_bounds = array<i64: 1, 32>}, {pipeline_mode = #tpu.pipeline_mode<synchronous>, transform_indices = @transform_3, window_bounds = array<i64: 1, 32>}, {pipeline_mode = #tpu.pipeline_mode<synchronous>, transform_indices = @transform_4, window_bounds = array<i64: 2, 32, 96>}, {pipeline_mode = #tpu.pipeline_mode<synchronous>, transform_indices = @transform_5, window_bounds = array<i64: 2, 1, 96>}, {pipeline_mode = #tpu.pipeline_mode<synchronous>, transform_indices = @transform_6, window_bounds = array<i64: 2, 2, 16, 32>}, {pipeline_mode = #tpu.pipeline_mode<synchronous>, transform_indices = @transform_7, window_bounds = array<i64: 2, 1, 32>}, {pipeline_mode = #tpu.pipeline_mode<synchronous>, transform_indices = @transform_8, window_bounds = array<i64: 2, 1, 32>}, {pipeline_mode = #tpu.pipeline_mode<synchronous>, transform_indices = @transform_9, window_bounds = array<i64: 2, 1, 32>}, {pipeline_mode = #tpu.pipeline_mode<synchronous>, transform_indices = @transform_10, window_bounds = array<i64: 2, 32, 64>}, {pipeline_mode = #tpu.pipeline_mode<synchronous>, transform_indices = @transform_11, window_bounds = array<i64: 2, 1, 64>}, {pipeline_mode = #tpu.pipeline_mode<synchronous>, transform_indices = @transform_12, window_bounds = array<i64: 2, 64, 32>}, {pipeline_mode = #tpu.pipeline_mode<synchronous>, transform_indices = @transform_13, window_bounds = array<i64: 2, 1, 32>}, {pipeline_mode = #tpu.pipeline_mode<synchronous>, transform_indices = @transform_14, window_bounds = array<i64: 2, 1, 32>}, {pipeline_mode = #tpu.pipeline_mode<synchronous>, transform_indices = @transform_15, window_bounds = array<i64: 2, 1, 32>}, {pipeline_mode = #tpu.pipeline_mode<synchronous>, transform_indices = @transform_16, window_bounds = array<i64: 32, 128>}, {pipeline_mode = #tpu.pipeline_mode<synchronous>, transform_indices = @transform_17, window_bounds = array<i64: 1, 128>}, {transform_indices = @transform_18, window_bounds = array<i64: 1, 8, 128>}]} {
    %c0 = arith.constant 0 : index
    %c0_0 = arith.constant 0 : index
    %c0_1 = arith.constant 0 : index
    %0 = vector.load %arg2[%c0, %c0_0, %c0_1] : memref<1x8x8xf32, #tpu.memory_space<vmem>>, vector<1x8x8xf32>
    %1 = vector.shape_cast %0 : vector<1x8x8xf32> to vector<8x8xf32>
    %c0_2 = arith.constant 0 : index
    %c0_3 = arith.constant 0 : index
    %c0_4 = arith.constant 0 : index
    %2 = vector.load %arg1[%c0_2, %c0_3, %c0_4] : memref<1x8x32xf32, #tpu.memory_space<vmem>>, vector<1x8x32xf32>
    %3 = vector.shape_cast %2 : vector<1x8x32xf32> to vector<8x32xf32>
    %c0_5 = arith.constant 0 : index
    %c0_6 = arith.constant 0 : index
    %4 = vector.load %arg3[%c0_5, %c0_6] : memref<1x32xf32, #tpu.memory_space<vmem>>, vector<1x32xf32>
    %c0_7 = arith.constant 0 : index
    %c0_8 = arith.constant 0 : index
    %5 = vector.load %arg4[%c0_7, %c0_8] : memref<1x32xf32, #tpu.memory_space<vmem>>, vector<1x32xf32>
    %cst = arith.constant dense<0.000000e+00> : vector<8xf32>
    %6 = vector.multi_reduction <add>, %3, %cst [1] : vector<8x32xf32> to vector<8xf32>
    %7 = vector.shape_cast %6 : vector<8xf32> to vector<8x1xf32>
    %cst_9 = arith.constant 3.200000e+01 : f32
    %8 = vector.broadcast %cst_9 : f32 to vector<8x1xf32>
    %9 = arith.divf %7, %8 : vector<8x1xf32>
    %10 = vector.broadcast %9 : vector<8x1xf32> to vector<8x32xf32>
    %11 = arith.subf %3, %10 : vector<8x32xf32>
    %12 = arith.mulf %11, %11 : vector<8x32xf32>
    %cst_10 = arith.constant dense<0.000000e+00> : vector<8xf32>
    %13 = vector.multi_reduction <add>, %12, %cst_10 [1] : vector<8x32xf32> to vector<8xf32>
    %14 = vector.shape_cast %13 : vector<8xf32> to vector<8x1xf32>
    %cst_11 = arith.constant 3.200000e+01 : f32
    %15 = vector.broadcast %cst_11 : f32 to vector<8x1xf32>
    %16 = arith.divf %14, %15 : vector<8x1xf32>
    %17 = vector.broadcast %9 : vector<8x1xf32> to vector<8x32xf32>
    %18 = arith.subf %3, %17 : vector<8x32xf32>
    %cst_12 = arith.constant 9.99999996E-13 : f32
    %19 = vector.broadcast %cst_12 : f32 to vector<8x1xf32>
    %20 = arith.addf %16, %19 : vector<8x1xf32>
    %21 = math.rsqrt %20 : vector<8x1xf32>
    %22 = vector.broadcast %21 : vector<8x1xf32> to vector<8x32xf32>
    %23 = arith.mulf %18, %22 : vector<8x32xf32>
    %24 = vector.broadcast %4 : vector<1x32xf32> to vector<8x32xf32>
    %25 = arith.mulf %23, %24 : vector<8x32xf32>
    %26 = vector.broadcast %5 : vector<1x32xf32> to vector<8x32xf32>
    %27 = arith.addf %25, %26 : vector<8x32xf32>
    %28 = arith.truncf %27 : vector<8x32xf32> to vector<8x32xbf16>
    %c0_13 = arith.constant 0 : index
    %c0_14 = arith.constant 0 : index
    %c0_15 = arith.constant 0 : index
    %29 = vector.load %arg5[%c0_13, %c0_14, %c0_15] : memref<2x32x96xbf16, #tpu.memory_space<vmem>>, vector<1x32x96xbf16>
    %30 = vector.shape_cast %29 : vector<1x32x96xbf16> to vector<32x96xbf16>
    %cst_16 = arith.constant dense<0.000000e+00> : vector<8x96xf32>
    %31 = tpu.matmul %28, %30, %cst_16 {dimension_numbers = #tpu.dot_dimension_numbers<[1], [0], [0], [1], [0, 0, 1, 1], [], []>} : vector<8x32xbf16>, vector<32x96xbf16>, vector<8x96xf32> -> vector<8x96xf32>
    %c0_17 = arith.constant 0 : index
    %c0_18 = arith.constant 0 : index
    %c0_19 = arith.constant 0 : index
    %32 = vector.load %arg6[%c0_17, %c0_18, %c0_19] : memref<2x1x96xf32, #tpu.memory_space<vmem>>, vector<1x1x96xf32>
    %33 = vector.shape_cast %32 : vector<1x1x96xf32> to vector<1x96xf32>
    %34 = vector.broadcast %33 : vector<1x96xf32> to vector<8x96xf32>
    %35 = arith.addf %31, %34 : vector<8x96xf32>
    %36 = vector.extract_strided_slice %35 {offsets = [0, 0], sizes = [8, 16], strides = [1, 1]} : vector<8x96xf32> to vector<8x16xf32>
    %37 = vector.extract_strided_slice %35 {offsets = [0, 16], sizes = [8, 16], strides = [1, 1]} : vector<8x96xf32> to vector<8x16xf32>
    %38 = vector.shape_cast %36 : vector<8x16xf32> to vector<1x8x16xf32>
    %39 = vector.shape_cast %37 : vector<8x16xf32> to vector<1x8x16xf32>
    %40 = tpu.concatenate %38, %39 in 0 : vector<1x8x16xf32>, vector<1x8x16xf32> -> vector<2x8x16xf32>
    %41 = arith.truncf %40 : vector<2x8x16xf32> to vector<2x8x16xbf16>
    %42 = vector.extract_strided_slice %35 {offsets = [0, 32], sizes = [8, 16], strides = [1, 1]} : vector<8x96xf32> to vector<8x16xf32>
    %43 = vector.extract_strided_slice %35 {offsets = [0, 48], sizes = [8, 16], strides = [1, 1]} : vector<8x96xf32> to vector<8x16xf32>
    %44 = vector.shape_cast %42 : vector<8x16xf32> to vector<1x8x16xf32>
    %45 = vector.shape_cast %43 : vector<8x16xf32> to vector<1x8x16xf32>
    %46 = tpu.concatenate %44, %45 in 0 : vector<1x8x16xf32>, vector<1x8x16xf32> -> vector<2x8x16xf32>
    %47 = arith.truncf %46 : vector<2x8x16xf32> to vector<2x8x16xbf16>
    %48 = vector.extract_strided_slice %35 {offsets = [0, 64], sizes = [8, 16], strides = [1, 1]} : vector<8x96xf32> to vector<8x16xf32>
    %49 = vector.extract_strided_slice %35 {offsets = [0, 80], sizes = [8, 16], strides = [1, 1]} : vector<8x96xf32> to vector<8x16xf32>
    %50 = vector.shape_cast %48 : vector<8x16xf32> to vector<1x8x16xf32>
    %51 = vector.shape_cast %49 : vector<8x16xf32> to vector<1x8x16xf32>
    %52 = tpu.concatenate %50, %51 in 0 : vector<1x8x16xf32>, vector<1x8x16xf32> -> vector<2x8x16xf32>
    %53 = arith.truncf %52 : vector<2x8x16xf32> to vector<2x8x16xbf16>
    "tpu.trace_start"() <{level = 10 : i32, message = "hqd,hkd->hqk"}> : () -> ()
    %cst_20 = arith.constant dense<0.000000e+00> : vector<2x8x8xf32>
    %54 = tpu.matmul %41, %47, %cst_20 {dimension_numbers = #tpu.dot_dimension_numbers<[2], [2], [1], [1], [0, 0, 0, 1, 1, 1], [0], [0]>} : vector<2x8x16xbf16>, vector<2x8x16xbf16>, vector<2x8x8xf32> -> vector<2x8x8xf32>
    "tpu.trace_stop"() : () -> ()
    %cst_21 = arith.constant 2.500000e-01 : f32
    %55 = vector.broadcast %cst_21 : f32 to vector<2x8x8xf32>
    %56 = arith.mulf %54, %55 : vector<2x8x8xf32>
    %57 = vector.shape_cast %1 : vector<8x8xf32> to vector<1x8x8xf32>
    %58 = vector.broadcast %57 : vector<1x8x8xf32> to vector<2x8x8xf32>
    %59 = arith.addf %56, %58 : vector<2x8x8xf32>
    %cst_22 = arith.constant dense<0xFF800000> : vector<2x8xf32>
    %60 = vector.multi_reduction <maximumf>, %59, %cst_22 [2] : vector<2x8x8xf32> to vector<2x8xf32>
    %61 = vector.shape_cast %60 : vector<2x8xf32> to vector<2x8x1xf32>
    %62 = vector.broadcast %61 : vector<2x8x1xf32> to vector<2x8x8xf32>
    %63 = arith.subf %59, %62 : vector<2x8x8xf32>
    %64 = math.exp %63 : vector<2x8x8xf32>
    %cst_23 = arith.constant dense<0.000000e+00> : vector<2x8xf32>
    %65 = vector.multi_reduction <add>, %64, %cst_23 [2] : vector<2x8x8xf32> to vector<2x8xf32>
    %66 = vector.shape_cast %65 : vector<2x8xf32> to vector<2x8x1xf32>
    %67 = tpu.reciprocal %66 {approx = true} : vector<2x8x1xf32> -> vector<2x8x1xf32>
    %68 = vector.broadcast %67 : vector<2x8x1xf32> to vector<2x8x8xf32>
    %69 = arith.mulf %64, %68 : vector<2x8x8xf32>
    %70 = arith.truncf %69 : vector<2x8x8xf32> to vector<2x8x8xbf16>
    "tpu.trace_start"() <{level = 10 : i32, message = "hqk,hkd->hqd"}> : () -> ()
    %cst_24 = arith.constant dense<0.000000e+00> : vector<2x8x16xf32>
    %71 = tpu.matmul %70, %53, %cst_24 {dimension_numbers = #tpu.dot_dimension_numbers<[2], [1], [1], [2], [0, 0, 0, 1, 1, 2], [0], [0]>} : vector<2x8x8xbf16>, vector<2x8x16xbf16>, vector<2x8x16xf32> -> vector<2x8x16xf32>
    "tpu.trace_stop"() : () -> ()
    %72 = arith.truncf %71 : vector<2x8x16xf32> to vector<2x8x16xbf16>
    %c0_25 = arith.constant 0 : index
    %c0_26 = arith.constant 0 : index
    %c0_27 = arith.constant 0 : index
    %c0_28 = arith.constant 0 : index
    %73 = vector.load %arg7[%c0_25, %c0_26, %c0_27, %c0_28] : memref<2x2x16x32xbf16, #tpu.memory_space<vmem>>, vector<1x2x16x32xbf16>
    %74 = vector.shape_cast %73 : vector<1x2x16x32xbf16> to vector<2x16x32xbf16>
    "tpu.trace_start"() <{level = 10 : i32, message = "hqd,hdo->hqo"}> : () -> ()
    %cst_29 = arith.constant dense<0.000000e+00> : vector<2x8x32xf32>
    %75 = tpu.matmul %72, %74, %cst_29 {dimension_numbers = #tpu.dot_dimension_numbers<[2], [1], [1], [2], [0, 0, 0, 1, 1, 2], [0], [0]>} : vector<2x8x16xbf16>, vector<2x16x32xbf16>, vector<2x8x32xf32> -> vector<2x8x32xf32>
    "tpu.trace_stop"() : () -> ()
    %76 = vector.extract_strided_slice %75 {offsets = [0, 0, 0], sizes = [1, 8, 32], strides = [1, 1, 1]} : vector<2x8x32xf32> to vector<1x8x32xf32>
    %77 = vector.shape_cast %76 : vector<1x8x32xf32> to vector<8x32xf32>
    %78 = vector.extract_strided_slice %75 {offsets = [1, 0, 0], sizes = [1, 8, 32], strides = [1, 1, 1]} : vector<2x8x32xf32> to vector<1x8x32xf32>
    %79 = vector.shape_cast %78 : vector<1x8x32xf32> to vector<8x32xf32>
    %80 = arith.addf %77, %79 : vector<8x32xf32>
    %c0_30 = arith.constant 0 : index
    %c0_31 = arith.constant 0 : index
    %c0_32 = arith.constant 0 : index
    %81 = vector.load %arg8[%c0_30, %c0_31, %c0_32] : memref<2x1x32xf32, #tpu.memory_space<vmem>>, vector<1x1x32xf32>
    %82 = vector.shape_cast %81 : vector<1x1x32xf32> to vector<1x32xf32>
    %83 = vector.broadcast %82 : vector<1x32xf32> to vector<8x32xf32>
    %84 = arith.addf %80, %83 : vector<8x32xf32>
    %85 = arith.addf %84, %27 : vector<8x32xf32>
    %c0_33 = arith.constant 0 : index
    %c0_34 = arith.constant 0 : index
    %c0_35 = arith.constant 0 : index
    %86 = vector.load %arg9[%c0_33, %c0_34, %c0_35] : memref<2x1x32xf32, #tpu.memory_space<vmem>>, vector<1x1x32xf32>
    %87 = vector.shape_cast %86 : vector<1x1x32xf32> to vector<1x32xf32>
    %c0_36 = arith.constant 0 : index
    %c0_37 = arith.constant 0 : index
    %c0_38 = arith.constant 0 : index
    %88 = vector.load %arg10[%c0_36, %c0_37, %c0_38] : memref<2x1x32xf32, #tpu.memory_space<vmem>>, vector<1x1x32xf32>
    %89 = vector.shape_cast %88 : vector<1x1x32xf32> to vector<1x32xf32>
    %cst_39 = arith.constant dense<0.000000e+00> : vector<8xf32>
    %90 = vector.multi_reduction <add>, %85, %cst_39 [1] : vector<8x32xf32> to vector<8xf32>
    %91 = vector.shape_cast %90 : vector<8xf32> to vector<8x1xf32>
    %cst_40 = arith.constant 3.200000e+01 : f32
    %92 = vector.broadcast %cst_40 : f32 to vector<8x1xf32>
    %93 = arith.divf %91, %92 : vector<8x1xf32>
    %94 = vector.broadcast %93 : vector<8x1xf32> to vector<8x32xf32>
    %95 = arith.subf %85, %94 : vector<8x32xf32>
    %96 = arith.mulf %95, %95 : vector<8x32xf32>
    %cst_41 = arith.constant dense<0.000000e+00> : vector<8xf32>
    %97 = vector.multi_reduction <add>, %96, %cst_41 [1] : vector<8x32xf32> to vector<8xf32>
    %98 = vector.shape_cast %97 : vector<8xf32> to vector<8x1xf32>
    %cst_42 = arith.constant 3.200000e+01 : f32
    %99 = vector.broadcast %cst_42 : f32 to vector<8x1xf32>
    %100 = arith.divf %98, %99 : vector<8x1xf32>
    %101 = vector.broadcast %93 : vector<8x1xf32> to vector<8x32xf32>
    %102 = arith.subf %85, %101 : vector<8x32xf32>
    %cst_43 = arith.constant 9.99999996E-13 : f32
    %103 = vector.broadcast %cst_43 : f32 to vector<8x1xf32>
    %104 = arith.addf %100, %103 : vector<8x1xf32>
    %105 = math.rsqrt %104 : vector<8x1xf32>
    %106 = vector.broadcast %105 : vector<8x1xf32> to vector<8x32xf32>
    %107 = arith.mulf %102, %106 : vector<8x32xf32>
    %108 = vector.broadcast %87 : vector<1x32xf32> to vector<8x32xf32>
    %109 = arith.mulf %107, %108 : vector<8x32xf32>
    %110 = vector.broadcast %89 : vector<1x32xf32> to vector<8x32xf32>
    %111 = arith.addf %109, %110 : vector<8x32xf32>
    %112 = arith.truncf %111 : vector<8x32xf32> to vector<8x32xbf16>
    %c0_44 = arith.constant 0 : index
    %c0_45 = arith.constant 0 : index
    %c0_46 = arith.constant 0 : index
    %113 = vector.load %arg11[%c0_44, %c0_45, %c0_46] : memref<2x32x64xbf16, #tpu.memory_space<vmem>>, vector<1x32x64xbf16>
    %114 = vector.shape_cast %113 : vector<1x32x64xbf16> to vector<32x64xbf16>
    %cst_47 = arith.constant dense<0.000000e+00> : vector<8x64xf32>
    %115 = tpu.matmul %112, %114, %cst_47 {dimension_numbers = #tpu.dot_dimension_numbers<[1], [0], [0], [1], [0, 0, 1, 1], [], []>} : vector<8x32xbf16>, vector<32x64xbf16>, vector<8x64xf32> -> vector<8x64xf32>
    %c0_48 = arith.constant 0 : index
    %c0_49 = arith.constant 0 : index
    %c0_50 = arith.constant 0 : index
    %116 = vector.load %arg12[%c0_48, %c0_49, %c0_50] : memref<2x1x64xf32, #tpu.memory_space<vmem>>, vector<1x1x64xf32>
    %117 = vector.shape_cast %116 : vector<1x1x64xf32> to vector<1x64xf32>
    %118 = vector.broadcast %117 : vector<1x64xf32> to vector<8x64xf32>
    %119 = arith.addf %115, %118 : vector<8x64xf32>
    %cst_51 = arith.constant 5.000000e-01 : f32
    %120 = vector.broadcast %cst_51 : f32 to vector<8x64xf32>
    %121 = arith.mulf %120, %119 : vector<8x64xf32>
    %cst_52 = arith.constant 4.471500e-02 : f32
    %122 = vector.broadcast %cst_52 : f32 to vector<8x64xf32>
    %123 = arith.mulf %122, %119 : vector<8x64xf32>
    %124 = arith.mulf %123, %119 : vector<8x64xf32>
    %125 = arith.mulf %124, %119 : vector<8x64xf32>
    %126 = arith.addf %119, %125 : vector<8x64xf32>
    %cst_53 = arith.constant 0.797884583 : f32
    %127 = vector.broadcast %cst_53 : f32 to vector<8x64xf32>
    %128 = arith.mulf %127, %126 : vector<8x64xf32>
    %129 = math.tanh %128 : vector<8x64xf32>
    %cst_54 = arith.constant 1.000000e+00 : f32
    %130 = vector.broadcast %cst_54 : f32 to vector<8x64xf32>
    %131 = arith.addf %130, %129 : vector<8x64xf32>
    %132 = arith.mulf %121, %131 : vector<8x64xf32>
    %133 = arith.truncf %132 : vector<8x64xf32> to vector<8x64xbf16>
    %c0_55 = arith.constant 0 : index
    %c0_56 = arith.constant 0 : index
    %c0_57 = arith.constant 0 : index
    %134 = vector.load %arg13[%c0_55, %c0_56, %c0_57] : memref<2x64x32xbf16, #tpu.memory_space<vmem>>, vector<1x64x32xbf16>
    %135 = vector.shape_cast %134 : vector<1x64x32xbf16> to vector<64x32xbf16>
    %cst_58 = arith.constant dense<0.000000e+00> : vector<8x32xf32>
    %136 = tpu.matmul %133, %135, %cst_58 {dimension_numbers = #tpu.dot_dimension_numbers<[1], [0], [0], [1], [0, 0, 1, 1], [], []>} : vector<8x64xbf16>, vector<64x32xbf16>, vector<8x32xf32> -> vector<8x32xf32>
    %c0_59 = arith.constant 0 : index
    %c0_60 = arith.constant 0 : index
    %c0_61 = arith.constant 0 : index
    %137 = vector.load %arg14[%c0_59, %c0_60, %c0_61] : memref<2x1x32xf32, #tpu.memory_space<vmem>>, vector<1x1x32xf32>
    %138 = vector.shape_cast %137 : vector<1x1x32xf32> to vector<1x32xf32>
    %139 = vector.broadcast %138 : vector<1x32xf32> to vector<8x32xf32>
    %140 = arith.addf %136, %139 : vector<8x32xf32>
    %141 = arith.addf %140, %111 : vector<8x32xf32>
    %c0_62 = arith.constant 0 : index
    %c0_63 = arith.constant 0 : index
    %c0_64 = arith.constant 0 : index
    %142 = vector.load %arg15[%c0_62, %c0_63, %c0_64] : memref<2x1x32xf32, #tpu.memory_space<vmem>>, vector<1x1x32xf32>
    %143 = vector.shape_cast %142 : vector<1x1x32xf32> to vector<1x32xf32>
    %c0_65 = arith.constant 0 : index
    %c0_66 = arith.constant 0 : index
    %c0_67 = arith.constant 0 : index
    %144 = vector.load %arg16[%c0_65, %c0_66, %c0_67] : memref<2x1x32xf32, #tpu.memory_space<vmem>>, vector<1x1x32xf32>
    %145 = vector.shape_cast %144 : vector<1x1x32xf32> to vector<1x32xf32>
    %cst_68 = arith.constant dense<0.000000e+00> : vector<8xf32>
    %146 = vector.multi_reduction <add>, %141, %cst_68 [1] : vector<8x32xf32> to vector<8xf32>
    %147 = vector.shape_cast %146 : vector<8xf32> to vector<8x1xf32>
    %cst_69 = arith.constant 3.200000e+01 : f32
    %148 = vector.broadcast %cst_69 : f32 to vector<8x1xf32>
    %149 = arith.divf %147, %148 : vector<8x1xf32>
    %150 = vector.broadcast %149 : vector<8x1xf32> to vector<8x32xf32>
    %151 = arith.subf %141, %150 : vector<8x32xf32>
    %152 = arith.mulf %151, %151 : vector<8x32xf32>
    %cst_70 = arith.constant dense<0.000000e+00> : vector<8xf32>
    %153 = vector.multi_reduction <add>, %152, %cst_70 [1] : vector<8x32xf32> to vector<8xf32>
    %154 = vector.shape_cast %153 : vector<8xf32> to vector<8x1xf32>
    %cst_71 = arith.constant 3.200000e+01 : f32
    %155 = vector.broadcast %cst_71 : f32 to vector<8x1xf32>
    %156 = arith.divf %154, %155 : vector<8x1xf32>
    %157 = vector.broadcast %149 : vector<8x1xf32> to vector<8x32xf32>
    %158 = arith.subf %141, %157 : vector<8x32xf32>
    %cst_72 = arith.constant 9.99999996E-13 : f32
    %159 = vector.broadcast %cst_72 : f32 to vector<8x1xf32>
    %160 = arith.addf %156, %159 : vector<8x1xf32>
    %161 = math.rsqrt %160 : vector<8x1xf32>
    %162 = vector.broadcast %161 : vector<8x1xf32> to vector<8x32xf32>
    %163 = arith.mulf %158, %162 : vector<8x32xf32>
    %164 = vector.broadcast %143 : vector<1x32xf32> to vector<8x32xf32>
    %165 = arith.mulf %163, %164 : vector<8x32xf32>
    %166 = vector.broadcast %145 : vector<1x32xf32> to vector<8x32xf32>
    %167 = arith.addf %165, %166 : vector<8x32xf32>
    %168 = arith.truncf %167 : vector<8x32xf32> to vector<8x32xbf16>
    %c1 = arith.constant 1 : index
    %c0_73 = arith.constant 0 : index
    %c0_74 = arith.constant 0 : index
    %169 = vector.load %arg5[%c1, %c0_73, %c0_74] : memref<2x32x96xbf16, #tpu.memory_space<vmem>>, vector<1x32x96xbf16>
    %170 = vector.shape_cast %169 : vector<1x32x96xbf16> to vector<32x96xbf16>
    %cst_75 = arith.constant dense<0.000000e+00> : vector<8x96xf32>
    %171 = tpu.matmul %168, %170, %cst_75 {dimension_numbers = #tpu.dot_dimension_numbers<[1], [0], [0], [1], [0, 0, 1, 1], [], []>} : vector<8x32xbf16>, vector<32x96xbf16>, vector<8x96xf32> -> vector<8x96xf32>
    %c1_76 = arith.constant 1 : index
    %c0_77 = arith.constant 0 : index
    %c0_78 = arith.constant 0 : index
    %172 = vector.load %arg6[%c1_76, %c0_77, %c0_78] : memref<2x1x96xf32, #tpu.memory_space<vmem>>, vector<1x1x96xf32>
    %173 = vector.shape_cast %172 : vector<1x1x96xf32> to vector<1x96xf32>
    %174 = vector.broadcast %173 : vector<1x96xf32> to vector<8x96xf32>
    %175 = arith.addf %171, %174 : vector<8x96xf32>
    %176 = vector.extract_strided_slice %175 {offsets = [0, 0], sizes = [8, 16], strides = [1, 1]} : vector<8x96xf32> to vector<8x16xf32>
    %177 = vector.extract_strided_slice %175 {offsets = [0, 16], sizes = [8, 16], strides = [1, 1]} : vector<8x96xf32> to vector<8x16xf32>
    %178 = vector.shape_cast %176 : vector<8x16xf32> to vector<1x8x16xf32>
    %179 = vector.shape_cast %177 : vector<8x16xf32> to vector<1x8x16xf32>
    %180 = tpu.concatenate %178, %179 in 0 : vector<1x8x16xf32>, vector<1x8x16xf32> -> vector<2x8x16xf32>
    %181 = arith.truncf %180 : vector<2x8x16xf32> to vector<2x8x16xbf16>
    %182 = vector.extract_strided_slice %175 {offsets = [0, 32], sizes = [8, 16], strides = [1, 1]} : vector<8x96xf32> to vector<8x16xf32>
    %183 = vector.extract_strided_slice %175 {offsets = [0, 48], sizes = [8, 16], strides = [1, 1]} : vector<8x96xf32> to vector<8x16xf32>
    %184 = vector.shape_cast %182 : vector<8x16xf32> to vector<1x8x16xf32>
    %185 = vector.shape_cast %183 : vector<8x16xf32> to vector<1x8x16xf32>
    %186 = tpu.concatenate %184, %185 in 0 : vector<1x8x16xf32>, vector<1x8x16xf32> -> vector<2x8x16xf32>
    %187 = arith.truncf %186 : vector<2x8x16xf32> to vector<2x8x16xbf16>
    %188 = vector.extract_strided_slice %175 {offsets = [0, 64], sizes = [8, 16], strides = [1, 1]} : vector<8x96xf32> to vector<8x16xf32>
    %189 = vector.extract_strided_slice %175 {offsets = [0, 80], sizes = [8, 16], strides = [1, 1]} : vector<8x96xf32> to vector<8x16xf32>
    %190 = vector.shape_cast %188 : vector<8x16xf32> to vector<1x8x16xf32>
    %191 = vector.shape_cast %189 : vector<8x16xf32> to vector<1x8x16xf32>
    %192 = tpu.concatenate %190, %191 in 0 : vector<1x8x16xf32>, vector<1x8x16xf32> -> vector<2x8x16xf32>
    %193 = arith.truncf %192 : vector<2x8x16xf32> to vector<2x8x16xbf16>
    "tpu.trace_start"() <{level = 10 : i32, message = "hqd,hkd->hqk"}> : () -> ()
    %cst_79 = arith.constant dense<0.000000e+00> : vector<2x8x8xf32>
    %194 = tpu.matmul %181, %187, %cst_79 {dimension_numbers = #tpu.dot_dimension_numbers<[2], [2], [1], [1], [0, 0, 0, 1, 1, 1], [0], [0]>} : vector<2x8x16xbf16>, vector<2x8x16xbf16>, vector<2x8x8xf32> -> vector<2x8x8xf32>
    "tpu.trace_stop"() : () -> ()
    %cst_80 = arith.constant 2.500000e-01 : f32
    %195 = vector.broadcast %cst_80 : f32 to vector<2x8x8xf32>
    %196 = arith.mulf %194, %195 : vector<2x8x8xf32>
    %197 = vector.shape_cast %1 : vector<8x8xf32> to vector<1x8x8xf32>
    %198 = vector.broadcast %197 : vector<1x8x8xf32> to vector<2x8x8xf32>
    %199 = arith.addf %196, %198 : vector<2x8x8xf32>
    %cst_81 = arith.constant dense<0xFF800000> : vector<2x8xf32>
    %200 = vector.multi_reduction <maximumf>, %199, %cst_81 [2] : vector<2x8x8xf32> to vector<2x8xf32>
    %201 = vector.shape_cast %200 : vector<2x8xf32> to vector<2x8x1xf32>
    %202 = vector.broadcast %201 : vector<2x8x1xf32> to vector<2x8x8xf32>
    %203 = arith.subf %199, %202 : vector<2x8x8xf32>
    %204 = math.exp %203 : vector<2x8x8xf32>
    %cst_82 = arith.constant dense<0.000000e+00> : vector<2x8xf32>
    %205 = vector.multi_reduction <add>, %204, %cst_82 [2] : vector<2x8x8xf32> to vector<2x8xf32>
    %206 = vector.shape_cast %205 : vector<2x8xf32> to vector<2x8x1xf32>
    %207 = tpu.reciprocal %206 {approx = true} : vector<2x8x1xf32> -> vector<2x8x1xf32>
    %208 = vector.broadcast %207 : vector<2x8x1xf32> to vector<2x8x8xf32>
    %209 = arith.mulf %204, %208 : vector<2x8x8xf32>
    %210 = arith.truncf %209 : vector<2x8x8xf32> to vector<2x8x8xbf16>
    "tpu.trace_start"() <{level = 10 : i32, message = "hqk,hkd->hqd"}> : () -> ()
    %cst_83 = arith.constant dense<0.000000e+00> : vector<2x8x16xf32>
    %211 = tpu.matmul %210, %193, %cst_83 {dimension_numbers = #tpu.dot_dimension_numbers<[2], [1], [1], [2], [0, 0, 0, 1, 1, 2], [0], [0]>} : vector<2x8x8xbf16>, vector<2x8x16xbf16>, vector<2x8x16xf32> -> vector<2x8x16xf32>
    "tpu.trace_stop"() : () -> ()
    %212 = arith.truncf %211 : vector<2x8x16xf32> to vector<2x8x16xbf16>
    %c1_84 = arith.constant 1 : index
    %c0_85 = arith.constant 0 : index
    %c0_86 = arith.constant 0 : index
    %c0_87 = arith.constant 0 : index
    %213 = vector.load %arg7[%c1_84, %c0_85, %c0_86, %c0_87] : memref<2x2x16x32xbf16, #tpu.memory_space<vmem>>, vector<1x2x16x32xbf16>
    %214 = vector.shape_cast %213 : vector<1x2x16x32xbf16> to vector<2x16x32xbf16>
    "tpu.trace_start"() <{level = 10 : i32, message = "hqd,hdo->hqo"}> : () -> ()
    %cst_88 = arith.constant dense<0.000000e+00> : vector<2x8x32xf32>
    %215 = tpu.matmul %212, %214, %cst_88 {dimension_numbers = #tpu.dot_dimension_numbers<[2], [1], [1], [2], [0, 0, 0, 1, 1, 2], [0], [0]>} : vector<2x8x16xbf16>, vector<2x16x32xbf16>, vector<2x8x32xf32> -> vector<2x8x32xf32>
    "tpu.trace_stop"() : () -> ()
    %216 = vector.extract_strided_slice %215 {offsets = [0, 0, 0], sizes = [1, 8, 32], strides = [1, 1, 1]} : vector<2x8x32xf32> to vector<1x8x32xf32>
    %217 = vector.shape_cast %216 : vector<1x8x32xf32> to vector<8x32xf32>
    %218 = vector.extract_strided_slice %215 {offsets = [1, 0, 0], sizes = [1, 8, 32], strides = [1, 1, 1]} : vector<2x8x32xf32> to vector<1x8x32xf32>
    %219 = vector.shape_cast %218 : vector<1x8x32xf32> to vector<8x32xf32>
    %220 = arith.addf %217, %219 : vector<8x32xf32>
    %c1_89 = arith.constant 1 : index
    %c0_90 = arith.constant 0 : index
    %c0_91 = arith.constant 0 : index
    %221 = vector.load %arg8[%c1_89, %c0_90, %c0_91] : memref<2x1x32xf32, #tpu.memory_space<vmem>>, vector<1x1x32xf32>
    %222 = vector.shape_cast %221 : vector<1x1x32xf32> to vector<1x32xf32>
    %223 = vector.broadcast %222 : vector<1x32xf32> to vector<8x32xf32>
    %224 = arith.addf %220, %223 : vector<8x32xf32>
    %225 = arith.addf %224, %167 : vector<8x32xf32>
    %c1_92 = arith.constant 1 : index
    %c0_93 = arith.constant 0 : index
    %c0_94 = arith.constant 0 : index
    %226 = vector.load %arg9[%c1_92, %c0_93, %c0_94] : memref<2x1x32xf32, #tpu.memory_space<vmem>>, vector<1x1x32xf32>
    %227 = vector.shape_cast %226 : vector<1x1x32xf32> to vector<1x32xf32>
    %c1_95 = arith.constant 1 : index
    %c0_96 = arith.constant 0 : index
    %c0_97 = arith.constant 0 : index
    %228 = vector.load %arg10[%c1_95, %c0_96, %c0_97] : memref<2x1x32xf32, #tpu.memory_space<vmem>>, vector<1x1x32xf32>
    %229 = vector.shape_cast %228 : vector<1x1x32xf32> to vector<1x32xf32>
    %cst_98 = arith.constant dense<0.000000e+00> : vector<8xf32>
    %230 = vector.multi_reduction <add>, %225, %cst_98 [1] : vector<8x32xf32> to vector<8xf32>
    %231 = vector.shape_cast %230 : vector<8xf32> to vector<8x1xf32>
    %cst_99 = arith.constant 3.200000e+01 : f32
    %232 = vector.broadcast %cst_99 : f32 to vector<8x1xf32>
    %233 = arith.divf %231, %232 : vector<8x1xf32>
    %234 = vector.broadcast %233 : vector<8x1xf32> to vector<8x32xf32>
    %235 = arith.subf %225, %234 : vector<8x32xf32>
    %236 = arith.mulf %235, %235 : vector<8x32xf32>
    %cst_100 = arith.constant dense<0.000000e+00> : vector<8xf32>
    %237 = vector.multi_reduction <add>, %236, %cst_100 [1] : vector<8x32xf32> to vector<8xf32>
    %238 = vector.shape_cast %237 : vector<8xf32> to vector<8x1xf32>
    %cst_101 = arith.constant 3.200000e+01 : f32
    %239 = vector.broadcast %cst_101 : f32 to vector<8x1xf32>
    %240 = arith.divf %238, %239 : vector<8x1xf32>
    %241 = vector.broadcast %233 : vector<8x1xf32> to vector<8x32xf32>
    %242 = arith.subf %225, %241 : vector<8x32xf32>
    %cst_102 = arith.constant 9.99999996E-13 : f32
    %243 = vector.broadcast %cst_102 : f32 to vector<8x1xf32>
    %244 = arith.addf %240, %243 : vector<8x1xf32>
    %245 = math.rsqrt %244 : vector<8x1xf32>
    %246 = vector.broadcast %245 : vector<8x1xf32> to vector<8x32xf32>
    %247 = arith.mulf %242, %246 : vector<8x32xf32>
    %248 = vector.broadcast %227 : vector<1x32xf32> to vector<8x32xf32>
    %249 = arith.mulf %247, %248 : vector<8x32xf32>
    %250 = vector.broadcast %229 : vector<1x32xf32> to vector<8x32xf32>
    %251 = arith.addf %249, %250 : vector<8x32xf32>
    %252 = arith.truncf %251 : vector<8x32xf32> to vector<8x32xbf16>
    %c1_103 = arith.constant 1 : index
    %c0_104 = arith.constant 0 : index
    %c0_105 = arith.constant 0 : index
    %253 = vector.load %arg11[%c1_103, %c0_104, %c0_105] : memref<2x32x64xbf16, #tpu.memory_space<vmem>>, vector<1x32x64xbf16>
    %254 = vector.shape_cast %253 : vector<1x32x64xbf16> to vector<32x64xbf16>
    %cst_106 = arith.constant dense<0.000000e+00> : vector<8x64xf32>
    %255 = tpu.matmul %252, %254, %cst_106 {dimension_numbers = #tpu.dot_dimension_numbers<[1], [0], [0], [1], [0, 0, 1, 1], [], []>} : vector<8x32xbf16>, vector<32x64xbf16>, vector<8x64xf32> -> vector<8x64xf32>
    %c1_107 = arith.constant 1 : index
    %c0_108 = arith.constant 0 : index
    %c0_109 = arith.constant 0 : index
    %256 = vector.load %arg12[%c1_107, %c0_108, %c0_109] : memref<2x1x64xf32, #tpu.memory_space<vmem>>, vector<1x1x64xf32>
    %257 = vector.shape_cast %256 : vector<1x1x64xf32> to vector<1x64xf32>
    %258 = vector.broadcast %257 : vector<1x64xf32> to vector<8x64xf32>
    %259 = arith.addf %255, %258 : vector<8x64xf32>
    %cst_110 = arith.constant 5.000000e-01 : f32
    %260 = vector.broadcast %cst_110 : f32 to vector<8x64xf32>
    %261 = arith.mulf %260, %259 : vector<8x64xf32>
    %cst_111 = arith.constant 4.471500e-02 : f32
    %262 = vector.broadcast %cst_111 : f32 to vector<8x64xf32>
    %263 = arith.mulf %262, %259 : vector<8x64xf32>
    %264 = arith.mulf %263, %259 : vector<8x64xf32>
    %265 = arith.mulf %264, %259 : vector<8x64xf32>
    %266 = arith.addf %259, %265 : vector<8x64xf32>
    %cst_112 = arith.constant 0.797884583 : f32
    %267 = vector.broadcast %cst_112 : f32 to vector<8x64xf32>
    %268 = arith.mulf %267, %266 : vector<8x64xf32>
    %269 = math.tanh %268 : vector<8x64xf32>
    %cst_113 = arith.constant 1.000000e+00 : f32
    %270 = vector.broadcast %cst_113 : f32 to vector<8x64xf32>
    %271 = arith.addf %270, %269 : vector<8x64xf32>
    %272 = arith.mulf %261, %271 : vector<8x64xf32>
    %273 = arith.truncf %272 : vector<8x64xf32> to vector<8x64xbf16>
    %c1_114 = arith.constant 1 : index
    %c0_115 = arith.constant 0 : index
    %c0_116 = arith.constant 0 : index
    %274 = vector.load %arg13[%c1_114, %c0_115, %c0_116] : memref<2x64x32xbf16, #tpu.memory_space<vmem>>, vector<1x64x32xbf16>
    %275 = vector.shape_cast %274 : vector<1x64x32xbf16> to vector<64x32xbf16>
    %cst_117 = arith.constant dense<0.000000e+00> : vector<8x32xf32>
    %276 = tpu.matmul %273, %275, %cst_117 {dimension_numbers = #tpu.dot_dimension_numbers<[1], [0], [0], [1], [0, 0, 1, 1], [], []>} : vector<8x64xbf16>, vector<64x32xbf16>, vector<8x32xf32> -> vector<8x32xf32>
    %c1_118 = arith.constant 1 : index
    %c0_119 = arith.constant 0 : index
    %c0_120 = arith.constant 0 : index
    %277 = vector.load %arg14[%c1_118, %c0_119, %c0_120] : memref<2x1x32xf32, #tpu.memory_space<vmem>>, vector<1x1x32xf32>
    %278 = vector.shape_cast %277 : vector<1x1x32xf32> to vector<1x32xf32>
    %279 = vector.broadcast %278 : vector<1x32xf32> to vector<8x32xf32>
    %280 = arith.addf %276, %279 : vector<8x32xf32>
    %281 = arith.addf %280, %251 : vector<8x32xf32>
    %c1_121 = arith.constant 1 : index
    %c0_122 = arith.constant 0 : index
    %c0_123 = arith.constant 0 : index
    %282 = vector.load %arg15[%c1_121, %c0_122, %c0_123] : memref<2x1x32xf32, #tpu.memory_space<vmem>>, vector<1x1x32xf32>
    %283 = vector.shape_cast %282 : vector<1x1x32xf32> to vector<1x32xf32>
    %c1_124 = arith.constant 1 : index
    %c0_125 = arith.constant 0 : index
    %c0_126 = arith.constant 0 : index
    %284 = vector.load %arg16[%c1_124, %c0_125, %c0_126] : memref<2x1x32xf32, #tpu.memory_space<vmem>>, vector<1x1x32xf32>
    %285 = vector.shape_cast %284 : vector<1x1x32xf32> to vector<1x32xf32>
    %cst_127 = arith.constant dense<0.000000e+00> : vector<8xf32>
    %286 = vector.multi_reduction <add>, %281, %cst_127 [1] : vector<8x32xf32> to vector<8xf32>
    %287 = vector.shape_cast %286 : vector<8xf32> to vector<8x1xf32>
    %cst_128 = arith.constant 3.200000e+01 : f32
    %288 = vector.broadcast %cst_128 : f32 to vector<8x1xf32>
    %289 = arith.divf %287, %288 : vector<8x1xf32>
    %290 = vector.broadcast %289 : vector<8x1xf32> to vector<8x32xf32>
    %291 = arith.subf %281, %290 : vector<8x32xf32>
    %292 = arith.mulf %291, %291 : vector<8x32xf32>
    %cst_129 = arith.constant dense<0.000000e+00> : vector<8xf32>
    %293 = vector.multi_reduction <add>, %292, %cst_129 [1] : vector<8x32xf32> to vector<8xf32>
    %294 = vector.shape_cast %293 : vector<8xf32> to vector<8x1xf32>
    %cst_130 = arith.constant 3.200000e+01 : f32
    %295 = vector.broadcast %cst_130 : f32 to vector<8x1xf32>
    %296 = arith.divf %294, %295 : vector<8x1xf32>
    %297 = vector.broadcast %289 : vector<8x1xf32> to vector<8x32xf32>
    %298 = arith.subf %281, %297 : vector<8x32xf32>
    %cst_131 = arith.constant 9.99999996E-13 : f32
    %299 = vector.broadcast %cst_131 : f32 to vector<8x1xf32>
    %300 = arith.addf %296, %299 : vector<8x1xf32>
    %301 = math.rsqrt %300 : vector<8x1xf32>
    %302 = vector.broadcast %301 : vector<8x1xf32> to vector<8x32xf32>
    %303 = arith.mulf %298, %302 : vector<8x32xf32>
    %304 = vector.broadcast %283 : vector<1x32xf32> to vector<8x32xf32>
    %305 = arith.mulf %303, %304 : vector<8x32xf32>
    %306 = vector.broadcast %285 : vector<1x32xf32> to vector<8x32xf32>
    %307 = arith.addf %305, %306 : vector<8x32xf32>
    %308 = arith.truncf %307 : vector<8x32xf32> to vector<8x32xbf16>
    %c0_132 = arith.constant 0 : index
    %c0_133 = arith.constant 0 : index
    %309 = vector.load %arg17[%c0_132, %c0_133] : memref<32x128xbf16, #tpu.memory_space<vmem>>, vector<32x128xbf16>
    %cst_134 = arith.constant dense<0.000000e+00> : vector<8x128xf32>
    %310 = tpu.matmul %308, %309, %cst_134 {dimension_numbers = #tpu.dot_dimension_numbers<[1], [0], [0], [1], [0, 0, 1, 1], [], []>} : vector<8x32xbf16>, vector<32x128xbf16>, vector<8x128xf32> -> vector<8x128xf32>
    %c0_135 = arith.constant 0 : index
    %c0_136 = arith.constant 0 : index
    %311 = vector.load %arg18[%c0_135, %c0_136] : memref<1x128xf32, #tpu.memory_space<vmem>>, vector<1x128xf32>
    %312 = vector.broadcast %311 : vector<1x128xf32> to vector<8x128xf32>
    %313 = arith.addf %310, %312 : vector<8x128xf32>
    %c0_137 = arith.constant 0 : index
    %c0_138 = arith.constant 0 : index
    %c0_139 = arith.constant 0 : index
    %314 = vector.load %arg19[%c0_137, %c0_138, %c0_139] : memref<1x8x128xf32, #tpu.memory_space<vmem>>, vector<1x8x128xf32>
    %315 = vector.shape_cast %314 : vector<1x8x128xf32> to vector<8x128xf32>
    %316 = vector.shape_cast %313 : vector<8x128xf32> to vector<1x8x128xf32>
    tpu.vector_store %arg19[%c0_137, %c0_138, %c0_139], %316 {strides = array<i32>} : memref<1x8x128xf32, #tpu.memory_space<vmem>>, vector<1x8x128xf32>,
    return
  }
  func.func @transform_0(%arg0: i32) -> (i32, i32, i32) {
    %c0_i32 = arith.constant 0 : i32
    %c0_i32_0 = arith.constant 0 : i32
    %c0_i32_1 = arith.constant 0 : i32
    return %arg0, %c0_i32, %c0_i32_0 : i32, i32, i32
  }
  func.func @transform_1(%arg0: i32) -> (i32, i32, i32) {
    %c0_i32 = arith.constant 0 : i32
    %c0_i32_0 = arith.constant 0 : i32
    %c0_i32_1 = arith.constant 0 : i32
    return %arg0, %c0_i32, %c0_i32_0 : i32, i32, i32
  }
  func.func @transform_2(%arg0: i32) -> (i32, i32) {
    %c0_i32 = arith.constant 0 : i32
    %c0_i32_0 = arith.constant 0 : i32
    %c0_i32_1 = arith.constant 0 : i32
    return %c0_i32, %c0_i32_0 : i32, i32
  }
  func.func @transform_3(%arg0: i32) -> (i32, i32) {
    %c0_i32 = arith.constant 0 : i32
    %c0_i32_0 = arith.constant 0 : i32
    %c0_i32_1 = arith.constant 0 : i32
    return %c0_i32, %c0_i32_0 : i32, i32
  }
  func.func @transform_4(%arg0: i32) -> (i32, i32, i32) {
    %c0_i32 = arith.constant 0 : i32
    %c0_i32_0 = arith.constant 0 : i32
    %c0_i32_1 = arith.constant 0 : i32
    %c0_i32_2 = arith.constant 0 : i32
    return %c0_i32, %c0_i32_0, %c0_i32_1 : i32, i32, i32
  }
  func.func @transform_5(%arg0: i32) -> (i32, i32, i32) {
    %c0_i32 = arith.constant 0 : i32
    %c0_i32_0 = arith.constant 0 : i32
    %c0_i32_1 = arith.constant 0 : i32
    %c0_i32_2 = arith.constant 0 : i32
    return %c0_i32, %c0_i32_0, %c0_i32_1 : i32, i32, i32
  }
  func.func @transform_6(%arg0: i32) -> (i32, i32, i32, i32) {
    %c0_i32 = arith.constant 0 : i32
    %c0_i32_0 = arith.constant 0 : i32
    %c0_i32_1 = arith.constant 0 : i32
    %c0_i32_2 = arith.constant 0 : i32
    %c0_i32_3 = arith.constant 0 : i32
    return %c0_i32, %c0_i32_0, %c0_i32_1, %c0_i32_2 : i32, i32, i32, i32
  }
  func.func @transform_7(%arg0: i32) -> (i32, i32, i32) {
    %c0_i32 = arith.constant 0 : i32
    %c0_i32_0 = arith.constant 0 : i32
    %c0_i32_1 = arith.constant 0 : i32
    %c0_i32_2 = arith.constant 0 : i32
    return %c0_i32, %c0_i32_0, %c0_i32_1 : i32, i32, i32
  }
  func.func @transform_8(%arg0: i32) -> (i32, i32, i32) {
    %c0_i32 = arith.constant 0 : i32
    %c0_i32_0 = arith.constant 0 : i32
    %c0_i32_1 = arith.constant 0 : i32
    %c0_i32_2 = arith.constant 0 : i32
    return %c0_i32, %c0_i32_0, %c0_i32_1 : i32, i32, i32
  }
  func.func @transform_9(%arg0: i32) -> (i32, i32, i32) {
    %c0_i32 = arith.constant 0 : i32
    %c0_i32_0 = arith.constant 0 : i32
    %c0_i32_1 = arith.constant 0 : i32
    %c0_i32_2 = arith.constant 0 : i32
    return %c0_i32, %c0_i32_0, %c0_i32_1 : i32, i32, i32
  }
  func.func @transform_10(%arg0: i32) -> (i32, i32, i32) {
    %c0_i32 = arith.constant 0 : i32
    %c0_i32_0 = arith.constant 0 : i32
    %c0_i32_1 = arith.constant 0 : i32
    %c0_i32_2 = arith.constant 0 : i32
    return %c0_i32, %c0_i32_0, %c0_i32_1 : i32, i32, i32
  }
  func.func @transform_11(%arg0: i32) -> (i32, i32, i32) {
    %c0_i32 = arith.constant 0 : i32
    %c0_i32_0 = arith.constant 0 : i32
    %c0_i32_1 = arith.constant 0 : i32
    %c0_i32_2 = arith.constant 0 : i32
    return %c0_i32, %c0_i32_0, %c0_i32_1 : i32, i32, i32
  }
  func.func @transform_12(%arg0: i32) -> (i32, i32, i32) {
    %c0_i32 = arith.constant 0 : i32
    %c0_i32_0 = arith.constant 0 : i32
    %c0_i32_1 = arith.constant 0 : i32
    %c0_i32_2 = arith.constant 0 : i32
    return %c0_i32, %c0_i32_0, %c0_i32_1 : i32, i32, i32
  }
  func.func @transform_13(%arg0: i32) -> (i32, i32, i32) {
    %c0_i32 = arith.constant 0 : i32
    %c0_i32_0 = arith.constant 0 : i32
    %c0_i32_1 = arith.constant 0 : i32
    %c0_i32_2 = arith.constant 0 : i32
    return %c0_i32, %c0_i32_0, %c0_i32_1 : i32, i32, i32
  }
  func.func @transform_14(%arg0: i32) -> (i32, i32, i32) {
    %c0_i32 = arith.constant 0 : i32
    %c0_i32_0 = arith.constant 0 : i32
    %c0_i32_1 = arith.constant 0 : i32
    %c0_i32_2 = arith.constant 0 : i32
    return %c0_i32, %c0_i32_0, %c0_i32_1 : i32, i32, i32
  }
  func.func @transform_15(%arg0: i32) -> (i32, i32, i32) {
    %c0_i32 = arith.constant 0 : i32
    %c0_i32_0 = arith.constant 0 : i32
    %c0_i32_1 = arith.constant 0 : i32
    %c0_i32_2 = arith.constant 0 : i32
    return %c0_i32, %c0_i32_0, %c0_i32_1 : i32, i32, i32
  }
  func.func @transform_16(%arg0: i32) -> (i32, i32) {
    %c0_i32 = arith.constant 0 : i32
    %c0_i32_0 = arith.constant 0 : i32
    %c0_i32_1 = arith.constant 0 : i32
    return %c0_i32, %c0_i32_0 : i32, i32
  }
  func.func @transform_17(%arg0: i32) -> (i32, i32) {
    %c0_i32 = arith.constant 0 : i32
    %c0_i32_0 = arith.constant 0 : i32
    %c0_i32_1 = arith.constant 0 : i32
    return %c0_i32, %c0_i32_0 : i32, i32
  }
  func.func @transform_18(%arg0: i32) -> (i32, i32, i32) {
    %c0_i32 = arith.constant 0 : i32
    %c0_i32_0 = arith.constant 0 : i32
    %c0_i32_1 = arith.constant 0 : i32
    return %arg0, %c0_i32, %c0_i32_0 : i32, i32, i32
  }
}

</mosaic_0001>

<bundles_post_ra>
// kernel: language_model_forward.1
= control target key start
LH: loop header
LB: loop body
LE: loop exit
PB: predicated region body
PF: predicated region fallthrough
CT: control target
= control target key end

     0   :  { %s2962_s0 = inlined_call_operand.vmem [shape: f32[2,8,32], index: 0, kind: input, shape index: {}]   ;;  %s2963_s1 = inlined_call_operand.vmem [shape: f32[2,8,8], index: 1, kind: input, shape index: {}]   ;;  %s2964_s2 = inlined_call_operand.vmem [shape: f32[1,32], index: 2, kind: input, shape index: {}]   ;;  %s2965_s3 = inlined_call_operand.vmem [shape: f32[1,32], index: 3, kind: input, shape index: {}]   ;;  %s2966_s4 = inlined_call_operand.vmem [shape: bf16[2,32,96], index: 4, kind: input, shape index: {}]   ;;  %s2967_s5 = inlined_call_operand.vmem [shape: f32[2,1,96], index: 5, kind: input, shape index: {}]   ;;  %s2968_s6 = inlined_call_operand.vmem [shape: bf16[2,2,16,32], index: 6, kind: input, shape index: {}]   ;;  %s2969_s7 = inlined_call_operand.vmem [shape: f32[2,1,32], index: 7, kind: input, shape index: {}]   ;;  %s2970_s8 = inlined_call_operand.vmem [shape: f32[2,1,32], index: 8, kind: input, shape index: {}]   ;;  %s2971_s9 = inlined_call_operand.vmem [shape: f32[2,1,32], index: 9, kind: input, shape index: {}]   ;;  %s2972_s10 = inlined_call_operand.vmem [shape: bf16[2,32,64], index: 10, kind: input, shape index: {}]   ;;  %s2973_s11 = inlined_call_operand.vmem [shape: f32[2,1,64], index: 11, kind: input, shape index: {}]   ;;  %s2974_s12 = inlined_call_operand.vmem [shape: bf16[2,64,32], index: 12, kind: input, shape index: {}]   ;;  %s2975_s13 = inlined_call_operand.vmem [shape: f32[2,1,32], index: 13, kind: input, shape index: {}]   ;;  %s2976_s14 = inlined_call_operand.vmem [shape: f32[2,1,32], index: 14, kind: input, shape index: {}]   ;;  %s2977_s15 = inlined_call_operand.vmem [shape: f32[2,1,32], index: 15, kind: input, shape index: {}]   ;;  %s2978_s16 = inlined_call_operand.vmem [shape: bf16[32,128], index: 16, kind: input, shape index: {}]   ;;  %s2979_s17 = inlined_call_operand.vmem [shape: f32[1,128], index: 17, kind: input, shape index: {}]   ;;  %s2980_s18 = inlined_call_operand.hbm [shape: f32[2,8,128], index: 18, kind: output, shape index: {}]  }
   0x1   :  { %2988 = sst [smem:[#allocation7_spill]] %s2962_s0 }
   0x2   :  { %2989 = sst [smem:[#allocation8_spill]] %s2963_s1 }
   0x3   :  { %2990 = sst [smem:[#allocation9_spill]] %s2964_s2 }
   0x4   :  { %2991 = sst [smem:[#allocation10_spill]] %s2965_s3 }
   0x5   :  { %2992 = sst [smem:[#allocation11_spill]] %s2966_s4 }
   0x6   :  { %23 = vsyncpa [#allocation3], 0 }
   0x7   :  { %25 = vsyncpa [#allocation3 + $0x1], 0  ;;  %s2590_s27 = smov 0   ;;  %s2592_s28 = smov 0  }
   0x8   :  { %s2594_s29 = smov 0   ;;  %s2596_s30 = smov 0  }
   0x9 LB: > { %2993 = sst [smem:[#allocation5_spill]] %s2483_s29  ;;  %s2611_s0 = sadd.s32 4294967295, %s2487_s30   ;;  %s2487_s30 = sphi %s2596_s30, %s3010_s30   ;;  %s2483_s29 = sphi %s2594_s29, %s3007_s29   ;;  %s2479_s28 = sphi %s2592_s28, %s3009_s28   ;;  %s2475_s27 = sphi %s2590_s27, %s3008_s27  }
   0xa   : > { %s2045_s19 = sadd.s32 4294967294, %s2487_s30   ;;  %s2615_s1 = sadd.s32 1, %s2487_s30  }
   0xb   : > { %s426_s20 = sadd.s32 1, %s2483_s29  ;;  %s423_s21 = ssub.s32 %s2487_s30, %s2615_s1 }
   0xc   : > { %p436_p0 = scmp.ne.s32.totalorder %s2483_s29, %s2479_s28  ;;  %p424_p1 = scmp.eq.s32.totalorder %s423_s21, 0 }
   0xd   : > { %p437_p2 = scmp.eq.s32.totalorder %s2611_s0, 1  ;;  %p442_p3 = scmp.ne.s32.totalorder %s2479_s28, %s2475_s27 }
   0xe   : > { %p443_p4 = scmp.eq.s32.totalorder %s2045_s19, 1  ;;  %p2048_p7 = scmp.ge.s32.totalorder %s2487_s30, 1 }
   0xf   : > { %s2626_s22 = scalar_select %p424_p1, %s2483_s29, %s426_s20  }
  0x10   : > { %p2628_p5 = por %p437_p2, %p436_p0  ;;  %p2632_p6 = por %p443_p4, %p442_p3 }
  0x11   : > { %2994 = sst [smem:[#allocation6_spill]] %s2626_s22  ;;  %p523_p8 = scmp.lt.s32.totalorder %s2487_s30, 3 }
  0x13   : > { %p524_p9 = pnand %p2048_p7, %p523_p8 }
  0x14   : > { %p580_p10 = scmp.lt.s32.totalorder (!%p524_p9), %s2611_s0, 1  ;;  %vm593_vm0 = vcmask (!%p524_p9), 261120   ;;  %s2997_s20 = sld [smem:[#allocation7_spill]] (!%p524_p9)  ;;  %v2489_v8 = vmov (!%p524_p9), 0.0   ;;  %vm2490_vm1 = vmmov (!%p524_p9), 0   ;;  %vm698_vm2 = vcmask (!%p524_p9), 130048  }
  0x15   : > { %527 = sbr.rel (%p524_p9) target bundleno = 5586 (0x15d2), region = 92  ;;  %s2998_s4 = sld [smem:[#allocation11_spill]] (!%p524_p9)  ;;  %2193 = vmatprep.subr.bf16.mxu0 (!%p524_p9), %v2489_v8  ;;  %2201 = vmatprep.subr.bf16.mxu1 (!%p524_p9), %v2489_v8  ;;  %v2054_v20 = vld [vmem:[%s2967_s5] ss:$0 sm:$0xff] (!%p524_p9)  ;;  %vm798_vm3 = vcmask (!%p524_p9), 64512   ;;  %vm828_vm4 = vcmask (!%p524_p9), 1043456  }
  0x16   : > { %2197 = vmatprep.mubr.msk.bf16.mxu0 (!%p524_p9), %vm2490_vm1, %v2489_v8  ;;  %2203 = vmatprep.mubr.msk.bf16.mxu1 (!%p524_p9), %vm2490_vm1, %v2489_v8  ;;  %s3000_s3 = sld [smem:[#allocation10_spill]] (!%p524_p9)  ;;  %s2987_s29 = smov (!%p524_p9), 112   ;;  %vm1179_vm5 = vcmask (!%p524_p9), 523264  }
  0x17   : > { %s2985_s22 = smov (!%p524_p9), 96   ;;  %s3002_s26 = sld [smem:[#allocation8_spill]] (!%p524_p9) }
  0x1b   : > { %v2373_v7 = vld [vmem:[%s2998_s4] sm:$0xff] (!%p524_p9)   ;;  %v2374_v9 = vld [vmem:[%s2998_s4 + $0x8] sm:$0xff] (!%p524_p9)  }
  0x1c   : > { %s2640_s24 = scalar_select %p580_p10, %s2611_s0, 1  ;;  %2194 = vmatpush3.bf16.msra.mxu0 %v2373_v7  ;;  %v2053_v16 = vld [vmem:[%s3000_s3] ss:$0 sm:$0xff]  ;;  %v2376_v7 = vld [vmem:[%s2968_s6 + $0x8] sm:$0xff]  }
  0x1d   : > { %2195 = vmatprep.subr.bf16.mxu0 %v2489_v8  ;;  %s2141_s3 = sshll.u32 %s2611_s0, 7 }
  0x1e   : > { %s2982_s25 = sshll.u32 %s2640_s24, 3 }
  0x1f   : > { %s583_s21 = scalar_lea.vmem %s2997_s20, %s2982_s25  ;;  %s2999_s20 = sld [smem:[#allocation9_spill]] }
  0x20   : > { %v590_v0 = vld [vmem:[%s583_s21] sm:$0xff]  ;;  %2196 = vmatpush3.bf16.msra.mxu0 %v2374_v9  ;;  %s3001_s25 = sshll.u32 %s2640_s24, 3  ;;  %s2983_s24 = smov 64  }
  0x21   : > { %v594_v1 = vsel %vm593_vm0, %v590_v0, 0.0  ;;  %2207 = vmatprep.subr.bf16.mxu0 %v2489_v8  ;;  %s587_s19 = scalar_lea.vmem %s3002_s26, %s3001_s25  ;;  %s3004_s21 = smov 96  }
  0x22   : > { %595 = vadd.xlane.f32.xlu0 %v594_v1  ;;  %v2698_v33 = vld [vmem:[%s587_s19] sm:$0xff]  ;;  %s3005_s26 = smov 64  }
  0x25   : > { %v2052_v14 = vld [vmem:[%s2999_s20] ss:$0 sm:$0xff]  ;;  %s3003_s20 = smov 112  }
  0xaf   : > { %v596_v2 = vpop.xlane.xlu0 %595 }
  0xb0   : > { %v598_v3 = vmul.f32 0.03125, %v596_v2 }
  0xb2   : > { %v599_v4 = vsub.f32 %v590_v0, %v598_v3 }
  0xb4   : > { %v600_v5 = vmul.f32 %v599_v4, %v599_v4 }
  0xb6   : > { %v601_v6 = vsel %vm593_vm0, %v600_v5, 0.0 }
  0xb7   : > { %602 = vadd.xlane.f32.xlu0 %v601_v6  ;;  %v2375_v6 = vld [vmem:[%s2968_s6] sm:$0xff]  }
 0x144   : > { %v603_v10 = vpop.xlane.xlu0 %602 }
 0x145   : > { %v604_v11 = vmul.f32 0.03125, %v603_v10 }
 0x147   : > { %v605_v12 = vadd.f32 1e-12, %v604_v11 }
 0x149   : > { %2395 = vrsqrt.f32 %v605_v12 }
 0x153   : > { %v2396_v13 = vpop.eup %2395 }
 0x154   : > { %v607_v15 = vmul.f32 %v2396_v13, %v599_v4 }
 0x156   : > { %v614_v17 = vmul.f32 %v2052_v14, %v607_v15 }
 0x158   : > { %v2670_v18 = vadd.f32 %v2053_v16, %v614_v17 }
 0x15a   : > { %v622_v19 = vpack.c.bf16 %v2670_v18, %v2670_v18 }
 0x15c   : > { %2198 = vmatmul.mubr.msk.bf16.vlgmr.msra.gmra.mrb[0].mxu0 %vm593_vm0, %v622_v19 }
 0x15d   : > { %2209 = vmatprep.mubr.msk.bf16.mxu0 %vm2490_vm1, %v2489_v8 }
 0x22f   : > { %v683_v21 = vpop.f32.mrb[0].mxu0 }
 0x230   : > { %v684_v22 = vadd.f32 %v2054_v20, %v683_v21  ;;  %v2199_v23 = vpop.f32.mrb[1].mxu0 }
 0x231   : > { %v686_v24 = vpop.f32.mrb[2].mxu0 }
 0x232   : > { %690 = vrot.lane.b32.xlu1 %v684_v22, %s2987_s29  ;;  %v2200_v25 = vpop.f32.mrb[3].mxu0  ;;  %v693_v26 = vpack.c.bf16 %v684_v22, %v684_v22 }
 0x233   : > { %v2066_v25 = vld [vmem:[%s2969_s7] ss:$0 sm:$0xff] }
 0x236   : > { %696 = vrot.lane.b32.xlu1 %v693_v26, %s2985_s22 }
 0x2a4   : > { %v691_v27 = vpop.permute.xlu1 %690 }
 0x2a5   : > { %v694_v28 = vpack.c.bf16 %v691_v27, %v691_v27 }
 0x2a7   : > { %746 = vrot.lane.b32.xlu0 %v694_v28, %s2985_s22  ;;  %s577_s22 = sand.u32 1, %s2479_s28  }
 0x2a8   : > { %v697_v29 = vpop.permute.xlu1 %696  ;;  %s1961_s25 = scalar_lea.sflag [#allocation3], %s577_s22 }
 0x2a9   : > { %v703_v30 = vsel %vm698_vm2, %v697_v29, 0 }
 0x2aa   : > { %2202 = vmatpush3.bf16.xpose.msra.mxu1 %v703_v30 }
 0x2ab   : > { %2213 = vmatprep.subr.bf16.mxu1 %v2489_v8 }
 0x2b1   : > { %2204 = vmatmul.mubr.msk.bf16.vlgmr.msra.gmra.mrb[0].mxu1 %vm698_vm2, %v693_v26 }
 0x2b2   : > { %2215 = vmatprep.mubr.msk.bf16.mxu1 %vm2490_vm1, %v2489_v8 }
 0x319   : > { %v747_v31 = vpop.permute.xlu0 %746 }
 0x31a   : > { %v752_v32 = vsel %vm698_vm2, %v747_v31, 0 }
 0x31b   : > { %2208 = vmatpush3.bf16.xpose.msra.mxu0 %v752_v32 }
 0x31c   : > { %2219 = vmatprep.subr.bf16.mxu0 %v2489_v8 }
 0x322   : > { %2210 = vmatmul.mubr.msk.bf16.vlgmr.msra.gmra.mrb[4].mxu0 %vm698_vm2, %v694_v28 }
 0x323   : > { %2221 = vmatprep.mubr.msk.bf16.mxu0 %vm2490_vm1, %v2489_v8 }
 0x384   : > { %v739_v34 = vpop.f32.mrb[0].mxu1 }
 0x385   : > { %v794_v35 = vmul.f32 0.25, %v739_v34  ;;  %v2205_v36 = vpop.f32.mrb[1].mxu1 }
 0x386   : > { %v742_v37 = vpop.f32.mrb[2].mxu1 }
 0x387   : > { %v2206_v38 = vpop.f32.mrb[3].mxu1  ;;  %v796_v39 = vadd.f32 %v794_v35, %v2698_v33 }
 0x389   : > { %v799_v40 = vsel %vm798_vm3, %v796_v39, -inf }
 0x38a   : > { %800 = vmax.xlane.f32.xlu1 %v799_v40 }
 0x3f5   : > { %v788_v41 = vpop.f32.mrb[4].mxu0 }
 0x3f6   : > { %v795_v42 = vmul.f32 0.25, %v788_v41  ;;  %v2211_v43 = vpop.f32.mrb[5].mxu0 }
 0x3f7   : > { %v791_v44 = vpop.f32.mrb[6].mxu0 }
 0x3f8   : > { %v2212_v45 = vpop.f32.mrb[7].mxu0  ;;  %v797_v46 = vadd.f32 %v795_v42, %v2698_v33  ;;  %v2067_v44 = vld [vmem:[%s2970_s8] ss:$0 sm:$0xff] }
 0x3fa   : > { %v802_v47 = vsel %vm798_vm3, %v797_v46, -inf }
 0x3fb   : > { %803 = vmax.xlane.f32.xlu0 %v802_v47 }
 0x411   : > { %872 = vrot.lane.b32.xlu0 %v694_v28, %s2983_s24 }
 0x417   : > { %v801_v48 = vpop.xlane.xlu1 %800 }
 0x418   : > { %v805_v49 = vsub.f32 %v796_v39, %v801_v48  ;;  %v2377_v39 = vld [vmem:[%s2972_s10] sm:$0xff]  }
 0x41a   : > { %v807_v50 = vmul.f32 1.442695, %v805_v49 }
 0x41c   : > { %2397 = vpow2.f32 %v807_v50  ;;  %v2379_v50 = vld [vmem:[%s2974_s12] sm:$0xff]  }
 0x426   : > { %v2398_v51 = vpop.eup %2397 }
 0x427   : > { %v811_v52 = vsel %vm798_vm3, %v2398_v51, 0.0 }
 0x428   : > { %812 = vadd.xlane.f32.xlu1 %v811_v52  ;;  %v2381_v52 = vld [vmem:[%s2974_s12 + $0x10] sm:$0xff]  }
 0x488   : > { %v804_v53 = vpop.xlane.xlu0 %803 }
 0x489   : > { %v806_v54 = vsub.f32 %v797_v46, %v804_v53  ;;  %v2068_v46 = vld [vmem:[%s2971_s9] ss:$0 sm:$0xff]  ;;  %v2382_v53 = vld [vmem:[%s2974_s12 + $0x18] sm:$0xff]  }
 0x48b   : > { %v809_v55 = vmul.f32 1.442695, %v806_v54  ;;  %v2069_v54 = vld [vmem:[%s2973_s11] ss:$0 sm:$0xff] }
 0x48c   : > { %v873_v56 = vpop.permute.xlu0 %872 }
 0x48d   : > { %2399 = vpow2.f32 %v809_v55  ;;  %v878_v57 = vsel %vm828_vm4, %v873_v56, 0 }
 0x48e   : > { %2220 = vmatpush3.bf16.msra.mxu0 %v878_v57 }
 0x48f   : > { %2231 = vmatprep.subr.bf16.mxu0 %v2489_v8 }
 0x497   : > { %v2400_v58 = vpop.eup %2399 }
 0x498   : > { %v814_v59 = vsel %vm798_vm3, %v2400_v58, 0.0 }
 0x499   : > { %815 = vadd.xlane.f32.xlu1 %v814_v59 }
 0x4aa   : > { %823 = vrot.lane.b32.xlu1 %v693_v26, %s2983_s24  ;;  %s2049_s24 = sshll.u32 %s577_s22, 3 }
 0x4b5   : > { %v813_v60 = vpop.xlane.xlu1 %812 }
 0x4b6   : > { %2401 = vrcp.f32 %v813_v60 }
 0x4c0   : > { %v2402_v61 = vpop.eup %2401 }
 0x4c1   : > { %v819_v63 = vmul.f32 %v2402_v61, %v2398_v51  ;;  %v2380_v51 = vld [vmem:[%s2974_s12 + $0x8] sm:$0xff]  }
 0x4c3   : > { %v821_v2 = vpack.c.bf16 %v819_v63, %v819_v63 }
 0x526   : > { %v816_v62 = vpop.xlane.xlu1 %815 }
 0x527   : > { %2403 = vrcp.f32 %v816_v62 }
 0x52a   : > { %v824_v0 = vpop.permute.xlu1 %823 }
 0x52b   : > { %v830_v1 = vsel %vm828_vm4, %v824_v0, 0 }
 0x52c   : > { %2214 = vmatpush3.bf16.msra.mxu1 %v830_v1 }
 0x52d   : > { %2225 = vmatprep.subr.bf16.mxu1 %v2489_v8 }
 0x52f   : > { %2216 = vmatmul.mubr.msk.bf16.vlgmr.msra.gmra.mrb[4].mxu1 %vm798_vm3, %v821_v2 }
 0x530   : > { %2227 = vmatprep.mubr.msk.bf16.mxu1 %vm2490_vm1, %v2489_v8  ;;  %2226 = vmatpush3.bf16.msra.mxu1 %v2375_v6  ;;  %v2073_v6 = vld [vmem:[%s2975_s13] ss:$0 sm:$0xff] }
 0x531   : > { %v2404_v3 = vpop.eup %2403  ;;  %2237 = vmatprep.subr.bf16.mxu1 %v2489_v8 }
 0x532   : > { %v820_v4 = vmul.f32 %v2404_v3, %v2400_v58 }
 0x534   : > { %v822_v5 = vpack.c.bf16 %v820_v4, %v820_v4 }
 0x536   : > { %2222 = vmatmul.mubr.msk.bf16.vlgmr.msra.gmra.mrb[8].mxu0 %vm798_vm3, %v822_v5 }
 0x537   : > { %2233 = vmatprep.mubr.msk.bf16.mxu0 %vm2490_vm1, %v2489_v8  ;;  %2232 = vmatpush3.bf16.msra.mxu0 %v2376_v7 }
 0x538   : > { %2245 = vmatprep.subr.bf16.mxu0 %v2489_v8 }
 0x602   : > { %v866_v9 = vpop.f32.mrb[4].mxu1 }
 0x603   : > { %v920_v10 = vpack.c.bf16 %v866_v9, %v866_v9  ;;  %v2217_v11 = vpop.f32.mrb[5].mxu1 }
 0x604   : > { %v869_v12 = vpop.f32.mrb[6].mxu1 }
 0x605   : > { %v2218_v13 = vpop.f32.mrb[7].mxu1  ;;  %2228 = vmatmul.mubr.msk.bf16.vlgmr.msra.gmra.mrb[8].mxu1 %vm698_vm2, %v920_v10 }
 0x606   : > { %2241 = vmatprep.mubr.msk.bf16.mxu1 %vm2490_vm1, %v2489_v8  ;;  %2238 = vmatpush3.bf16.msra.mxu1 %v2377_v39 }
 0x607   : > { %2239 = vmatprep.subr.bf16.mxu1 %v2489_v8 }
 0x609   : > { %v914_v14 = vpop.f32.mrb[8].mxu0 }
 0x60a   : > { %v921_v15 = vpack.c.bf16 %v914_v14, %v914_v14  ;;  %v2223_v16 = vpop.f32.mrb[9].mxu0 }
 0x60b   : > { %v917_v17 = vpop.f32.mrb[10].mxu0 }
 0x60c   : > { %v2224_v19 = vpop.f32.mrb[11].mxu0  ;;  %2234 = vmatmul.mubr.msk.bf16.vlgmr.msra.gmra.mrb[12].mxu0 %vm698_vm2, %v921_v15 }
 0x60d   : > { %2253 = vmatprep.mubr.msk.bf16.mxu0 %vm2490_vm1, %v2489_v8  ;;  %2246 = vmatpush3.bf16.msra.mxu0 %v2379_v50 }
 0x60e   : > { %2247 = vmatprep.subr.bf16.mxu0 %v2489_v8 }
 0x611   : > { %2248 = vmatpush3.bf16.msra.mxu0 %v2380_v51 }
 0x612   : > { %2249 = vmatprep.subr.bf16.mxu0 %v2489_v8 }
 0x615   : > { %2250 = vmatpush3.bf16.msra.mxu0 %v2381_v52 }
 0x616   : > { %2251 = vmatprep.subr.bf16.mxu0 %v2489_v8 }
 0x619   : > { %2252 = vmatpush3.bf16.msra.mxu0 %v2382_v53 }
 0x61a   : > { %2271 = vmatprep.subr.bf16.mxu0 %v2489_v8 }
 0x6d8   : > { %v969_v20 = vpop.f32.mrb[8].mxu1 }
 0x6d9   : > { %v2229_v21 = vpop.f32.mrb[9].mxu1 }
 0x6da   : > { %v972_v22 = vpop.f32.mrb[10].mxu1  ;;  %v2383_v21 = vld [vmem:[%s2998_s4 + $0x10] sm:$0xff]  }
 0x6db   : > { %v2230_v23 = vpop.f32.mrb[11].mxu1  ;;  %v2384_v22 = vld [vmem:[%s2998_s4 + $0x18] sm:$0xff]   ;;  %s2920_s4 = scalar_lea.hbm %s2980_s18, %s2141_s3 }
 0x6df   : > { %v1018_v24 = vpop.f32.mrb[12].mxu0 }
 0x6e0   : > { %v1024_v26 = vadd.f32 %v1018_v24, %v969_v20  ;;  %v2235_v27 = vpop.f32.mrb[13].mxu0 }
 0x6e1   : > { %v1021_v28 = vpop.f32.mrb[14].mxu0  ;;  %v2079_v27 = vld [vmem:[%s2976_s14] ss:$0 sm:$0xff] }
 0x6e2   : > { %v1032_v29 = vadd.f32 %v2066_v25, %v1024_v26  ;;  %v2236_v30 = vpop.f32.mrb[15].mxu0 }
 0x6e4   : > { %v1033_v31 = vadd.f32 %v1032_v29, %v2670_v18  ;;  %v2378_v18 = vld [vmem:[%s2972_s10 + $0x8] sm:$0xff]   ;;  %v2080_v29 = vld [vmem:[%s2977_s15] ss:$0 sm:$0xff] }
 0x6e5   : > { %2240 = vmatpush3.bf16.msra.mxu1 %v2378_v18 }
 0x6e6   : > { %v1036_v32 = vsel %vm593_vm0, %v1033_v31, 0.0  ;;  %2257 = vmatprep.subr.bf16.mxu1 %v2489_v8 }
 0x6e7   : > { %1037 = vadd.xlane.f32.xlu1 %v1036_v32 }
 0x774   : > { %v1038_v34 = vpop.xlane.xlu1 %1037 }
 0x775   : > { %v1039_v35 = vmul.f32 0.03125, %v1038_v34  ;;  %v2086_v34 = vld [vmem:[%s2967_s5 + $0x1] ss:$0 sm:$0xff] }
 0x777   : > { %v1040_v36 = vsub.f32 %v1033_v31, %v1039_v35 }
 0x779   : > { %v1041_v37 = vmul.f32 %v1040_v36, %v1040_v36 }
 0x77b   : > { %v1042_v38 = vsel %vm593_vm0, %v1041_v37, 0.0 }
 0x77c   : > { %1043 = vadd.xlane.f32.xlu0 %v1042_v38 }
 0x809   : > { %v1044_v40 = vpop.xlane.xlu0 %1043 }
 0x80a   : > { %v1045_v41 = vmul.f32 0.03125, %v1044_v40 }
 0x80c   : > { %v1046_v42 = vadd.f32 1e-12, %v1045_v41 }
 0x80e   : > { %2405 = vrsqrt.f32 %v1046_v42 }
 0x818   : > { %v2406_v43 = vpop.eup %2405 }
 0x819   : > { %v1048_v45 = vmul.f32 %v2406_v43, %v1040_v36 }
 0x81b   : > { %v1055_v47 = vmul.f32 %v2067_v44, %v1048_v45 }
 0x81d   : > { %v1062_v48 = vadd.f32 %v2068_v46, %v1055_v47 }
 0x81f   : > { %v1063_v49 = vpack.c.bf16 %v1062_v48, %v1062_v48 }
 0x821   : > { %2242 = vmatmul.mubr.msk.bf16.vlgmr.msra.gmra.mrb[12].mxu1 %vm593_vm0, %v1063_v49 }
 0x822   : > { %2261 = vmatprep.mubr.msk.bf16.mxu1 %vm2490_vm1, %v2489_v8  ;;  %2258 = vmatpush3.bf16.msra.mxu1 %v2383_v21 }
 0x823   : > { %2259 = vmatprep.subr.bf16.mxu1 %v2489_v8 }
 0x826   : > { %2260 = vmatpush3.bf16.msra.mxu1 %v2384_v22 }
 0x827   : > { %2265 = vmatprep.subr.bf16.mxu1 %v2489_v8 }
 0x8f4   : > { %v1124_v55 = vpop.f32.mrb[12].mxu1 }
 0x8f5   : > { %v1125_v56 = vadd.f32 %v2069_v54, %v1124_v55  ;;  %v2243_v57 = vpop.f32.mrb[13].mxu1 }
 0x8f6   : > { %v1127_v58 = vpop.f32.mrb[14].mxu1 }
 0x8f7   : > { %v1131_v59 = vmul.f32 0.044715, %v1125_v56  ;;  %v2244_v60 = vpop.f32.mrb[15].mxu1  ;;  %v1130_v2 = vmul.f32 0.5, %v1125_v56 }
 0x8f9   : > { %v1132_v61 = vmul.f32 %v1131_v59, %v1125_v56 }
 0x8fb   : > { %v1133_v62 = vmul.f32 %v1132_v61, %v1125_v56 }
 0x8fd   : > { %v1134_v63 = vadd.f32 %v1133_v62, %v1125_v56 }
 0x8ff   : > { %v1135_v0 = vmul.f32 0.7978846, %v1134_v63 }
 0x901   : > { %2407 = vtanh.f32 %v1135_v0 }
 0x90b   : > { %v2408_v1 = vpop.eup %2407 }
 0x90c   : > { %v1137_v3 = vadd.f32 1.0, %v2408_v1 }
 0x90e   : > { %v1138_v4 = vmul.f32 %v1137_v3, %v1130_v2 }
 0x910   : > { %v1139_v5 = vpack.c.bf16 %v1138_v4, %v1138_v4 }
 0x912   : > { %2254 = vmatmul.mubr.msk.bf16.vlgmr.msra.gmra.mrb[16].mxu0 %vm1179_vm5, %v1139_v5 }
 0x913   : > { %2273 = vmatprep.mubr.msk.bf16.mxu0 %vm2490_vm1, %v2489_v8 }
 0x9e5   : > { %v1217_v7 = vpop.f32.mrb[16].mxu0 }
 0x9e6   : > { %v1218_v9 = vadd.f32 %v2073_v6, %v1217_v7  ;;  %v2255_v10 = vpop.f32.mrb[17].mxu0 }
 0x9e7   : > { %v1220_v11 = vpop.f32.mrb[18].mxu0 }
 0x9e8   : > { %v2256_v12 = vpop.f32.mrb[19].mxu0  ;;  %v1223_v13 = vadd.f32 %v1218_v9, %v1062_v48 }
 0x9e9   : > { %v2385_v12 = vld [vmem:[%s2968_s6 + $0x10] sm:$0xff]  }
 0x9ea   : > { %v1226_v14 = vsel %vm593_vm0, %v1223_v13, 0.0 }
 0x9eb   : > { %1227 = vadd.xlane.f32.xlu1 %v1226_v14 }
 0xa78   : > { %v1228_v15 = vpop.xlane.xlu1 %1227 }
 0xa79   : > { %v1229_v16 = vmul.f32 0.03125, %v1228_v15 }
 0xa7b   : > { %v1230_v17 = vsub.f32 %v1223_v13, %v1229_v16 }
 0xa7d   : > { %v1231_v19 = vmul.f32 %v1230_v17, %v1230_v17 }
 0xa7f   : > { %v1232_v20 = vsel %vm593_vm0, %v1231_v19, 0.0  ;;  %v2386_v19 = vld [vmem:[%s2968_s6 + $0x18] sm:$0xff]  }
 0xa80   : > { %1233 = vadd.xlane.f32.xlu1 %v1232_v20 }
 0xb0d   : > { %v1234_v23 = vpop.xlane.xlu1 %1233 }
 0xb0e   : > { %v1235_v24 = vmul.f32 0.03125, %v1234_v23 }
 0xb10   : > { %v1236_v25 = vadd.f32 1e-12, %v1235_v24 }
 0xb12   : > { %2409 = vrsqrt.f32 %v1236_v25 }
 0xb1c   : > { %v2410_v26 = vpop.eup %2409 }
 0xb1d   : > { %v1238_v28 = vmul.f32 %v2410_v26, %v1230_v17 }
 0xb1f   : > { %v1245_v30 = vmul.f32 %v2079_v27, %v1238_v28 }
 0xb21   : > { %v2796_v31 = vadd.f32 %v2080_v29, %v1245_v30 }
 0xb23   : > { %v1253_v32 = vpack.c.bf16 %v2796_v31, %v2796_v31 }
 0xb25   : > { %2262 = vmatmul.mubr.msk.bf16.vlgmr.msra.gmra.mrb[16].mxu1 %vm593_vm0, %v1253_v32 }
 0xb26   : > { %2267 = vmatprep.mubr.msk.bf16.mxu1 %vm2490_vm1, %v2489_v8 }
 0xbf8   : > { %v1316_v35 = vpop.f32.mrb[16].mxu1 }
 0xbf9   : > { %v1317_v36 = vadd.f32 %v2086_v34, %v1316_v35  ;;  %v2263_v37 = vpop.f32.mrb[17].mxu1 }
 0xbfa   : > { %v1319_v38 = vpop.f32.mrb[18].mxu1 }
 0xbfb   : > { %v1326_v39 = vpack.c.bf16 %v1317_v36, %v1317_v36  ;;  %1323 = vrot.lane.b32.xlu1 %v1317_v36, %s3003_s20  ;;  %v2264_v18 = vpop.f32.mrb[19].mxu1  ;;  %v2103_v38 = vld [vmem:[%s2969_s7 + $0x1] ss:$0 sm:$0xff] }
 0xbfd   : > { %1329 = vrot.lane.b32.xlu0 %v1326_v39, %s3004_s21 }
 0xc6d   : > { %v1324_v40 = vpop.permute.xlu1 %1323 }
 0xc6e   : > { %v1327_v41 = vpack.c.bf16 %v1324_v40, %v1324_v40 }
 0xc6f   : > { %v1330_v42 = vpop.permute.xlu0 %1329 }
 0xc70   : > { %v1335_v43 = vsel %vm698_vm2, %v1330_v42, 0  ;;  %1378 = vrot.lane.b32.xlu1 %v1327_v41, %s3004_s21  ;;  %s579_s21 = scalar_lea.vmem [#allocation2], %s2049_s24  ;;  %s2494_s24 = smov [#allocation2]  }
 0xc71   : > { %2266 = vmatpush3.bf16.xpose.msra.mxu1 %v1335_v43  ;;  %s2429_s20 = sshll.u32 %s2494_s24, 4  ;;  %s2430_s20 = int_to_ptr.vmem [resolvable:$false] %s2429_s20 }
 0xc72   : > { %2277 = vmatprep.subr.bf16.mxu1 %v2489_v8  ;;  %s2431_s19 = scalar_lea.vmem %s2430_s20, 256 }
 0xc78   : > { %2268 = vmatmul.mubr.msk.bf16.vlgmr.msra.gmra.mrb[20].mxu1 %vm698_vm2, %v1326_v39 }
 0xc79   : > { %2279 = vmatprep.mubr.msk.bf16.mxu1 %vm2490_vm1, %v2489_v8 }
 0xce2   : > { %v1379_v44 = vpop.permute.xlu1 %1378 }
 0xce3   : > { %v1384_v45 = vsel %vm698_vm2, %v1379_v44, 0 }
 0xce4   : > { %2272 = vmatpush3.bf16.xpose.msra.mxu0 %v1384_v45 }
 0xce5   : > { %2283 = vmatprep.subr.bf16.mxu0 %v2489_v8 }
 0xceb   : > { %2274 = vmatmul.mubr.msk.bf16.vlgmr.msra.gmra.mrb[20].mxu0 %vm698_vm2, %v1327_v41 }
 0xcec   : > { %2285 = vmatprep.mubr.msk.bf16.mxu0 %vm2490_vm1, %v2489_v8 }
 0xd4b   : > { %v1371_v46 = vpop.f32.mrb[20].mxu1 }
 0xd4c   : > { %v1426_v47 = vmul.f32 0.25, %v1371_v46  ;;  %v2269_v48 = vpop.f32.mrb[21].mxu1 }
 0xd4d   : > { %v1374_v49 = vpop.f32.mrb[22].mxu1 }
 0xd4e   : > { %v2270_v50 = vpop.f32.mrb[23].mxu1  ;;  %v1428_v51 = vadd.f32 %v1426_v47, %v2698_v33 }
 0xd4f   : > { %v2387_v50 = vld [vmem:[%s2972_s10 + $0x10] sm:$0xff]  }
 0xd50   : > { %v1430_v52 = vsel %vm798_vm3, %v1428_v51, -inf }
 0xd51   : > { %1431 = vmax.xlane.f32.xlu1 %v1430_v52 }
 0xdbe   : > { %v1420_v53 = vpop.f32.mrb[20].mxu0 }
 0xdbf   : > { %v1427_v54 = vmul.f32 0.25, %v1420_v53  ;;  %v2275_v55 = vpop.f32.mrb[21].mxu0 }
 0xdc0   : > { %v1423_v56 = vpop.f32.mrb[22].mxu0  ;;  %v2106_v55 = vld [vmem:[%s2970_s8 + $0x1] ss:$0 sm:$0xff] }
 0xdc1   : > { %v2276_v57 = vpop.f32.mrb[23].mxu0  ;;  %v1429_v58 = vadd.f32 %v1427_v54, %v2698_v33 }
 0xdc2   : > { %v2107_v57 = vld [vmem:[%s2971_s9 + $0x1] ss:$0 sm:$0xff] }
 0xdc3   : > { %v1433_v59 = vsel %vm798_vm3, %v1429_v58, -inf }
 0xdc4   : > { %1434 = vmax.xlane.f32.xlu0 %v1433_v59 }
 0xdde   : > { %v1432_v60 = vpop.xlane.xlu1 %1431 }
 0xddf   : > { %v1436_v61 = vsub.f32 %v1428_v51, %v1432_v60 }
 0xde1   : > { %v1438_v62 = vmul.f32 1.442695, %v1436_v61  ;;  %v2389_v61 = vld [vmem:[%s2974_s12 + $0x20] sm:$0xff]  }
 0xde3   : > { %2411 = vpow2.f32 %v1438_v62  ;;  %v2390_v62 = vld [vmem:[%s2974_s12 + $0x28] sm:$0xff]  }
 0xded   : > { %v2412_v63 = vpop.eup %2411 }
 0xdee   : > { %v1442_v0 = vsel %vm798_vm3, %v2412_v63, 0.0 }
 0xdef   : > { %1443 = vadd.xlane.f32.xlu0 %v1442_v0  ;;  %v2392_v0 = vld [vmem:[%s2974_s12 + $0x38] sm:$0xff]  }
 0xe05   : > { %1454 = vrot.lane.b32.xlu0 %v1326_v39, %s3005_s26 }
 0xe51   : > { %v1435_v1 = vpop.xlane.xlu0 %1434 }
 0xe52   : > { %v1437_v2 = vsub.f32 %v1429_v58, %v1435_v1  ;;  %v2113_v1 = vld [vmem:[%s2973_s11 + $0x1] ss:$0 sm:$0xff] }
 0xe54   : > { %v1440_v3 = vmul.f32 1.442695, %v1437_v2 }
 0xe56   : > { %2413 = vpow2.f32 %v1440_v3 }
 0xe60   : > { %v2414_v4 = vpop.eup %2413 }
 0xe61   : > { %v1445_v33 = vsel %vm798_vm3, %v2414_v4, 0.0 }
 0xe62   : > { %1446 = vadd.xlane.f32.xlu1 %v1445_v33 }
 0xe73   : > { %1502 = vrot.lane.b32.xlu1 %v1327_v41, %s3005_s26  ;;  %s1974_s26 = sshll.u32 %s579_s21, 4  ;;  %s2922_s26 = int_to_ptr.vmem [resolvable:$true] %s1974_s26 }
 0xe74   : > { %s2425_s0 = scalar_lea.vmem %s2922_s26, 128  ;;  %p2432_p0 = scmp.lt.s32.totalorder %s2922_s26, %s2430_s20 }
 0xe75   : > { %p2426_p11 = scmp.ne.s32.totalorder %s2922_s26, %s2425_s0  ;;  %p2433_p1 = scmp.lt.s32.totalorder %s2431_s19, %s2425_s0 }
 0xe77   : > { %p2427_p12 = pnand %p2426_p11, %p2628_p5  ;;  %p2434_p2 = por %p2433_p1, %p2432_p0 }
 0xe79   : > { %p2428_p13 = pneg %p2427_p12 }
 0xe7b   : > { %p2435_p3 = pnand %p2434_p2, %p2428_p13 }
 0xe7c   : > { %v1444_v5 = vpop.xlane.xlu0 %1443 }
 0xe7d   : > { %2415 = vrcp.f32 %v1444_v5 }
 0xe80   : > { %v1455_v6 = vpop.permute.xlu0 %1454 }
 0xe81   : > { %v1460_v7 = vsel %vm828_vm4, %v1455_v6, 0 }
 0xe82   : > { %2278 = vmatpush3.bf16.msra.mxu1 %v1460_v7 }
 0xe83   : > { %2289 = vmatprep.subr.bf16.mxu1 %v2489_v8 }
 0xe87   : > { %v2416_v9 = vpop.eup %2415 }
 0xe88   : > { %v1450_v10 = vmul.f32 %v2416_v9, %v2412_v63  ;;  %v2391_v63 = vld [vmem:[%s2974_s12 + $0x30] sm:$0xff]  }
 0xe8a   : > { %v1452_v11 = vpack.c.bf16 %v1450_v10, %v1450_v10 }
 0xe8c   : > { %2280 = vmatmul.mubr.msk.bf16.vlgmr.msra.gmra.mrb[24].mxu1 %vm798_vm3, %v1452_v11 }
 0xe8d   : > { %2291 = vmatprep.mubr.msk.bf16.mxu1 %vm2490_vm1, %v2489_v8  ;;  %2290 = vmatpush3.bf16.msra.mxu1 %v2385_v12 }
 0xe8e   : > { %2301 = vmatprep.subr.bf16.mxu1 %v2489_v8 }
 0xeef   : > { %v1447_v13 = vpop.xlane.xlu1 %1446 }
 0xef0   : > { %2417 = vrcp.f32 %v1447_v13 }
 0xef3   : > { %v1503_v14 = vpop.permute.xlu1 %1502 }
 0xef4   : > { %v1508_v15 = vsel %vm828_vm4, %v1503_v14, 0 }
 0xef5   : > { %2284 = vmatpush3.bf16.msra.mxu0 %v1508_v15 }
 0xef6   : > { %2295 = vmatprep.subr.bf16.mxu0 %v2489_v8 }
 0xefa   : > { %v2418_v16 = vpop.eup %2417 }
 0xefb   : > { %v1451_v17 = vmul.f32 %v2418_v16, %v2414_v4 }
 0xefd   : > { %v1453_v20 = vpack.c.bf16 %v1451_v17, %v1451_v17  ;;  %v2126_v17 = vld [vmem:[%s2975_s13 + $0x1] ss:$0 sm:$0xff] }
 0xeff   : > { %2286 = vmatmul.mubr.msk.bf16.vlgmr.msra.gmra.mrb[24].mxu0 %vm798_vm3, %v1453_v20 }
 0xf00   : > { %2296 = vmatpush3.bf16.msra.mxu0 %v2386_v19  ;;  %2297 = vmatprep.mubr.msk.bf16.mxu0 %vm2490_vm1, %v2489_v8 }
 0xf01   : > { %2309 = vmatprep.subr.bf16.mxu0 %v2489_v8 }
 0xf5f   : > { %v1496_v21 = vpop.f32.mrb[24].mxu1 }
 0xf60   : > { %v1550_v22 = vpack.c.bf16 %v1496_v21, %v1496_v21  ;;  %v2281_v23 = vpop.f32.mrb[25].mxu1 }
 0xf61   : > { %v1499_v24 = vpop.f32.mrb[26].mxu1 }
 0xf62   : > { %v2282_v25 = vpop.f32.mrb[27].mxu1  ;;  %2292 = vmatmul.mubr.msk.bf16.vlgmr.msra.gmra.mrb[28].mxu1 %vm698_vm2, %v1550_v22 }
 0xf63   : > { %2305 = vmatprep.mubr.msk.bf16.mxu1 %vm2490_vm1, %v2489_v8  ;;  %2302 = vmatpush3.bf16.msra.mxu1 %v2387_v50 }
 0xf64   : > { %2303 = vmatprep.subr.bf16.mxu1 %v2489_v8 }
 0xfd2   : > { %v1544_v26 = vpop.f32.mrb[24].mxu0 }
 0xfd3   : > { %v1551_v27 = vpack.c.bf16 %v1544_v26, %v1544_v26  ;;  %v2287_v28 = vpop.f32.mrb[25].mxu0 }
 0xfd4   : > { %v1547_v29 = vpop.f32.mrb[26].mxu0 }
 0xfd5   : > { %v2288_v30 = vpop.f32.mrb[27].mxu0  ;;  %2298 = vmatmul.mubr.msk.bf16.vlgmr.msra.gmra.mrb[28].mxu0 %vm698_vm2, %v1551_v27 }
 0xfd6   : > { %2317 = vmatprep.mubr.msk.bf16.mxu0 %vm2490_vm1, %v2489_v8  ;;  %2310 = vmatpush3.bf16.msra.mxu0 %v2389_v61 }
 0xfd7   : > { %2311 = vmatprep.subr.bf16.mxu0 %v2489_v8 }
 0xfda   : > { %2312 = vmatpush3.bf16.msra.mxu0 %v2390_v62 }
 0xfdb   : > { %2313 = vmatprep.subr.bf16.mxu0 %v2489_v8 }
 0xfde   : > { %2314 = vmatpush3.bf16.msra.mxu0 %v2391_v63 }
 0xfdf   : > { %2315 = vmatprep.subr.bf16.mxu0 %v2489_v8 }
 0xfe2   : > { %2316 = vmatpush3.bf16.msra.mxu0 %v2392_v0 }
0x1035   : > { %v1600_v32 = vpop.f32.mrb[28].mxu1 }
0x1036   : > { %v2293_v34 = vpop.f32.mrb[29].mxu1 }
0x1037   : > { %v1603_v35 = vpop.f32.mrb[30].mxu1  ;;  %v2394_v34 = vld [vmem:[%s2978_s16 + $0x8] sm:$0xff]  }
0x1038   : > { %v2294_v36 = vpop.f32.mrb[31].mxu1 }
0x10a8   : > { %v1649_v37 = vpop.f32.mrb[28].mxu0 }
0x10a9   : > { %v1655_v39 = vadd.f32 %v1649_v37, %v1600_v32  ;;  %v2299_v18 = vpop.f32.mrb[29].mxu0  ;;  %v2393_v32 = vld [vmem:[%s2978_s16] sm:$0xff]  }
0x10aa   : > { %v1652_v40 = vpop.f32.mrb[30].mxu0 }
0x10ab   : > { %v1664_v41 = vadd.f32 %v2103_v38, %v1655_v39  ;;  %v2300_v42 = vpop.f32.mrb[31].mxu0  ;;  %v2134_v39 = vld [vmem:[%s2976_s14 + $0x1] ss:$0 sm:$0xff] }
0x10ad   : > { %v1665_v43 = vadd.f32 %v1664_v41, %v2796_v31  ;;  %v2388_v31 = vld [vmem:[%s2972_s10 + $0x18] sm:$0xff]  }
0x10ae   : > { %2304 = vmatpush3.bf16.msra.mxu1 %v2388_v31 }
0x10af   : > { %v1670_v44 = vsel %vm593_vm0, %v1665_v43, 0.0  ;;  %2321 = vmatprep.subr.bf16.mxu1 %v2489_v8 }
0x10b0   : > { %1671 = vadd.xlane.f32.xlu1 %v1670_v44 }
0x113d   : > { %v1672_v45 = vpop.xlane.xlu1 %1671 }
0x113e   : > { %v1673_v46 = vmul.f32 0.03125, %v1672_v45 }
0x1140   : > { %v1674_v47 = vsub.f32 %v1665_v43, %v1673_v46  ;;  %v2136_v43 = vld [vmem:[%s2979_s17] ss:$0 sm:$0xff] }
0x1142   : > { %v1675_v48 = vmul.f32 %v1674_v47, %v1674_v47 }
0x1144   : > { %v1676_v49 = vsel %vm593_vm0, %v1675_v48, 0.0 }
0x1145   : > { %1677 = vadd.xlane.f32.xlu0 %v1676_v49 }
0x11d2   : > { %v1678_v51 = vpop.xlane.xlu0 %1677 }
0x11d3   : > { %v1679_v52 = vmul.f32 0.03125, %v1678_v51 }
0x11d5   : > { %v1680_v53 = vadd.f32 1e-12, %v1679_v52 }
0x11d7   : > { %2419 = vrsqrt.f32 %v1680_v53 }
0x11e1   : > { %v2420_v54 = vpop.eup %2419 }
0x11e2   : > { %v1682_v56 = vmul.f32 %v2420_v54, %v1674_v47 }
0x11e4   : > { %v1689_v58 = vmul.f32 %v2106_v55, %v1682_v56 }
0x11e6   : > { %v1696_v59 = vadd.f32 %v2107_v57, %v1689_v58 }
0x11e8   : > { %v1697_v60 = vpack.c.bf16 %v1696_v59, %v1696_v59 }
0x11ea   : > { %2306 = vmatmul.mubr.msk.bf16.vlgmr.msra.gmra.mrb[32].mxu1 %vm593_vm0, %v1697_v60 }
0x11eb   : > { %2325 = vmatprep.mubr.msk.bf16.mxu1 %vm2490_vm1, %v2489_v8  ;;  %2322 = vmatpush3.bf16.msra.mxu1 %v2393_v32 }
0x11ec   : > { %2323 = vmatprep.subr.bf16.mxu1 %v2489_v8  ;;  %v2135_v8 = vld [vmem:[%s2977_s15 + $0x1] ss:$0 sm:$0xff] }
0x11ef   : > { %2324 = vmatpush3.bf16.msra.mxu1 %v2394_v34 }
0x12bd   : > { %v1760_v2 = vpop.f32.mrb[32].mxu1 }
0x12be   : > { %v1761_v3 = vadd.f32 %v2113_v1, %v1760_v2  ;;  %v2307_v4 = vpop.f32.mrb[33].mxu1 }
0x12bf   : > { %v1763_v33 = vpop.f32.mrb[34].mxu1 }
0x12c0   : > { %v1767_v5 = vmul.f32 0.044715, %v1761_v3  ;;  %v2308_v6 = vpop.f32.mrb[35].mxu1  ;;  %v1766_v13 = vmul.f32 0.5, %v1761_v3 }
0x12c2   : > { %v1768_v7 = vmul.f32 %v1767_v5, %v1761_v3 }
0x12c4   : > { %v1769_v9 = vmul.f32 %v1768_v7, %v1761_v3 }
0x12c6   : > { %v1770_v10 = vadd.f32 %v1769_v9, %v1761_v3 }
0x12c8   : > { %v1771_v11 = vmul.f32 0.7978846, %v1770_v10 }
0x12ca   : > { %2421 = vtanh.f32 %v1771_v11 }
0x12d4   : > { %v2422_v12 = vpop.eup %2421 }
0x12d5   : > { %v1773_v14 = vadd.f32 1.0, %v2422_v12 }
0x12d7   : > { %v1774_v15 = vmul.f32 %v1773_v14, %v1766_v13 }
0x12d9   : > { %v1775_v16 = vpack.c.bf16 %v1774_v15, %v1774_v15 }
0x12db   : > { %2318 = vmatmul.mubr.msk.bf16.vlgmr.msra.gmra.mrb[32].mxu0 %vm1179_vm5, %v1775_v16 }
0x13ae   : > { %v1854_v19 = vpop.f32.mrb[32].mxu0 }
0x13af   : > { %v1855_v20 = vadd.f32 %v2126_v17, %v1854_v19  ;;  %v2319_v21 = vpop.f32.mrb[33].mxu0 }
0x13b0   : > { %v1857_v22 = vpop.f32.mrb[34].mxu0 }
0x13b1   : > { %v2320_v23 = vpop.f32.mrb[35].mxu0  ;;  %v1860_v24 = vadd.f32 %v1855_v20, %v1696_v59 }
0x13b3   : > { %v1865_v25 = vsel %vm593_vm0, %v1860_v24, 0.0 }
0x13b4   : > { %1866 = vadd.xlane.f32.xlu0 %v1865_v25 }
0x1441   : > { %v1867_v26 = vpop.xlane.xlu0 %1866 }
0x1442   : > { %v1868_v27 = vmul.f32 0.03125, %v1867_v26 }
0x1444   : > { %v1869_v28 = vsub.f32 %v1860_v24, %v1868_v27 }
0x1446   : > { %v1870_v29 = vmul.f32 %v1869_v28, %v1869_v28 }
0x1448   : > { %v1871_v30 = vsel %vm593_vm0, %v1870_v29, 0.0 }
0x1449   : > { %1872 = vadd.xlane.f32.xlu1 %v1871_v30 }
0x14d6   : > { %v1873_v35 = vpop.xlane.xlu1 %1872 }
0x14d7   : > { %v1874_v36 = vmul.f32 0.03125, %v1873_v35 }
0x14d9   : > { %v1875_v37 = vadd.f32 1e-12, %v1874_v36 }
0x14db   : > { %2423 = vrsqrt.f32 %v1875_v37 }
0x14e5   : > { %v2424_v38 = vpop.eup %2423 }
0x14e6   : > { %v1877_v18 = vmul.f32 %v2424_v38, %v1869_v28 }
0x14e8   : > { %v1884_v40 = vmul.f32 %v2134_v39, %v1877_v18 }
0x14ea   : > { %v1891_v41 = vadd.f32 %v2135_v8, %v1884_v40 }
0x14ec   : > { %v1892_v42 = vpack.c.bf16 %v1891_v41, %v1891_v41 }
0x14ee   : > { %2326 = vmatmul.mubr.msk.bf16.vlgmr.msra.gmra.mrb[36].mxu1 %vm593_vm0, %v1892_v42 }
0x15c1   : > { %v1953_v44 = vpop.f32.mrb[36].mxu1 }
0x15c2   : > { %v1954_v45 = vadd.f32 %v2136_v43, %v1953_v44  ;;  %v2327_v46 = vpop.f32.mrb[37].mxu1 }
0x15c3   : > { %v1956_v47 = vpop.f32.mrb[38].mxu1 }
0x15c4   : > { %1959 = vst [vmem:[%s579_s21] sm:$0xff] %v1954_v45  ;;  %v2328_v48 = vpop.f32.mrb[39].mxu1 }
0x15c5   : > { %2438 = shalt.err (!%p2435_p3)
}
0x15c6   : > { %s2439_s3 = scalar_lea.hbm %s2920_s4, 128  ;;  %s2443_s29 = scalar_lea.hbm %s2980_s18, 256 }
0x15c7   : > { %p2440_p4 = scmp.ne.s32.totalorder %s2920_s4, %s2439_s3  ;;  %p2444_p9 = scmp.lt.u32.totalorder %s2920_s4, %s2980_s18 }
0x15c8   : > { %p2445_p10 = scmp.lt.u32.totalorder %s2443_s29, %s2439_s3  ;;  %p2447_p12 = scmp.lt.u32.totalorder %s2439_s3, %s2920_s4 }
0x15c9   : > { %p2441_p7 = pnand %p2440_p4, %p2628_p5 }
0x15ca   : > { %p2446_p11 = por %p2445_p10, %p2444_p9 }
0x15cb   : > { %p2442_p8 = pneg %p2441_p7 }
0x15cc   : > { %p2448_p13 = por %p2447_p12, %p2446_p11 }
0x15ce   : > { %p2449_p0 = pnand %p2448_p13, %p2442_p8 }
0x15d0   : > { %2452 = shalt.err (!%p2449_p0)
}
0x15d1   : > { %2329 = dma.vmem_to_hbm [thread:$0]  (%p2628_p5), %s2922_s26, 128, %s2920_s4, %s1961_s25  }
0x15d2 PF: > { %p2335_p1 = scmp.ge.s32.totalorder %s2487_s30, 2  ;;  %s1986_s0 = sand.u32 1, %s2475_s27  }
0x15d3   : > { %s1987_s19 = scalar_lea.sflag [#allocation3], %s1986_s0 }
0x15d4   : > { %p2332_p2 = pnand %p2335_p1, %p2632_p6 }
0x15d6   : > { %2470 = dma.done.wait (!%p2332_p2), %s1987_s19, 128  }
0x15d7   : > { %2472 = vsyncadd (!%p2332_p2), %s1987_s19, 4294967168  ;;  %s3006_s3 = sld [smem:[#allocation5_spill]]  ;;  %s3007_s29 = sld [smem:[#allocation6_spill]] }
0x15d8   : > { %p28_p3 = scmp.ge.s32.totalorder %s2615_s1, 4   ;;  %s3008_s27 = smov %s2479_s28 }
0x15d9   : > { %s3010_s30 = smov %s2615_s1 }
0x15da   :  { %30 = sbr.rel (!%p28_p3) target bundleno = 9 (0x9), region = 142 }
0x15dd   : > { %s3009_s28 = smov %s3006_s3 }
0x15e1   :  { %1992 = vsyncpa [#allocation3], 1 }
0x15e2   :  { %1994 = vsyncpa [#allocation3 + $0x1], 1 }

</bundles_post_ra>
